<compile_context>
chip_gen: v5e
topology: v5e:2x2
jax: 0.10.0
libtpu: 0.0.40
codegen_flags: <defaults>
</compile_context>

<pallas_src>
import functools

import jax
import jax.numpy as jnp
from jax.experimental import pallas as pl
from jax.experimental.pallas import tpu as pltpu

IMG_DIM = 14 * 28     # 392
LATENT_DIM = 10


def _round_up(x, m):
    return ((x + m - 1) // m) * m


def _pick_batch_tile(bp8, batch_tile):
    """Multiple-of-8 batch tile; prefer >=2 grid steps, avoid >50% pad waste."""
    if bp8 <= 8:
        return 8
    if bp8 <= batch_tile:
        # Split in two so the "parallel" grid axis can shard across both
        # TensorCores on v7x (negligible cost elsewhere).
        return _round_up((bp8 + 1) // 2, 8)
    tb = batch_tile
    while tb > 64:
        waste = _round_up(bp8, tb) - bp8
        if 2 * waste <= tb:
            break
        tb = _round_up(tb // 2, 8)
    return tb


def supuca_kernel(z_ref, wbd_ref, vproj_ref, vchain_ref, vbig2_ref,
                  lat_ref, proj_ref, chain_ref):
    """Four fused MXU passes for the whole SupUCA forward.

    z_ref      : (TB, ZD)   packed [X | Y], zero padded to 128-lane width
    wbd_ref    : (ZD, LP)   block-diag [Wx.T ; Wy.T]
    vproj_ref  : (LP, PD)   [Vx.T | Vy.T | Vy.T | Vx.T] at img_dim-wide offsets
    vchain_ref : (LP, LP)   block-diag [Kyy ; Kxx]  (Kyy=Vy.T@Wy.T, Kxx=Vx.T@Wx.T)
    vbig2_ref  : (LP, CD)   block-diag [Vx.T ; Vy.T]
    """
    f32 = jnp.float32

    # Pass 1: latents.  cols 0:L = W_x X, cols L:2L = W_y Y, rest exact zero.
    h = jnp.dot(z_ref[...], wbd_ref[...], preferred_element_type=f32)
    lat_ref[...] = h

    # Pass 2: all four V projections -> lane-dense HBM slab.
    proj_ref[...] = jnp.dot(h, vproj_ref[...], preferred_element_type=f32)

    # Pass 3: chain intermediates [WxX@Kyy | WyY@Kxx] -- local value only,
    # never written back to HBM.
    mc = jnp.dot(h, vchain_ref[...], preferred_element_type=f32)

    # Pass 4: chains [chain_x | chain_y].
    chain_ref[...] = jnp.dot(mc, vbig2_ref[...], preferred_element_type=f32)


@functools.partial(jax.jit, static_argnames=("img_dim", "latent_dim", "batch_tile"))
def supuca_forward(X, Y, Wx, Wy, Vx, Vy,
                   img_dim=IMG_DIM, latent_dim=LATENT_DIM, batch_tile=256):
    f32 = jnp.float32
    B = X.shape[0]
    Xf = X.reshape(B, img_dim).astype(f32)
    Yf = Y.reshape(B, img_dim).astype(f32)
    Wx = Wx.astype(f32)
    Wy = Wy.astype(f32)
    Vx = Vx.astype(f32)
    Vy = Vy.astype(f32)

    L = latent_dim
    D = img_dim                           # 392: internal offsets are NOT padded
    LP = _round_up(2 * L, 128)            # latent slab width (128)
    ZD = _round_up(2 * D, 128)            # packed [X|Y] slab width:     896
    PD = _round_up(4 * D, 128)            # packed projection slab width: 1664
    CD = _round_up(2 * D, 128)            # packed [chain_x|chain_y]:     896

    # Batch padding (multiple of 8 sublanes) + adaptive batch tiling.
    Bp8 = _round_up(B, 8)
    TB = _pick_batch_tile(Bp8, batch_tile)
    Bp = _round_up(Bp8, TB)
    grid = (Bp // TB,)

    # ---- pack activations: Z = [X | Y], zero padded (exact) ----
    Z = jnp.zeros((Bp, ZD), f32)
    Z = Z.at[:B, 0:D].set(Xf)
    Z = Z.at[:B, D:2 * D].set(Yf)

    # ---- pack weights (weight-only; hoist/cache if weights are static) ----
    WxT, WyT = Wx.T, Wy.T                 # (D, L)
    VxT, VyT = Vx.T, Vy.T                 # (L, D)
    Kyy = VyT @ WyT                       # (L, L): chain_x reassociation
    Kxx = VxT @ WxT                       # (L, L): chain_y reassociation

    # Block-diagonal so Z @ Wbd = [WxX | WyY | 0...] in one MXU pass.
    Wbd = jnp.zeros((ZD, LP), f32)
    Wbd = Wbd.at[0:D, 0:L].set(WxT)
    Wbd = Wbd.at[D:2 * D, L:2 * L].set(WyT)

    # One RHS producing all four V projections at D-wide offsets.
    Vproj = jnp.zeros((LP, PD), f32)
    Vproj = Vproj.at[0:L, 0:D].set(VxT)                 # -> V_x W_x X
    Vproj = Vproj.at[L:2 * L, D:2 * D].set(VyT)         # -> V_y W_y Y
    Vproj = Vproj.at[0:L, 2 * D:3 * D].set(VyT)         # -> V_y W_x X
    Vproj = Vproj.at[L:2 * L, 3 * D:4 * D].set(VxT)     # -> V_x W_y Y

    # Tiny block-diagonal RHS for the chain intermediates (VMEM-local in kernel).
    Vchain = jnp.zeros((LP, LP), f32)
    Vchain = Vchain.at[0:L, 0:L].set(Kyy)               # -> WxX @ Kyy
    Vchain = Vchain.at[L:2 * L, L:2 * L].set(Kxx)       # -> WyY @ Kxx

    # Block-diagonal RHS for the two chain outputs.
    Vbig2 = jnp.zeros((LP, CD), f32)
    Vbig2 = Vbig2.at[0:L, 0:D].set(VxT)                 # -> chain_x
    Vbig2 = Vbig2.at[L:2 * L, D:2 * D].set(VyT)         # -> chain_y

    w_elems = ZD * LP + LP * PD + LP * LP + LP * CD
    flops = 2 * Bp * w_elems
    bytes_accessed = 4 * (Bp * (ZD + LP + PD + CD) + grid[0] * w_elems)

    lat, proj, chain = pl.pallas_call(
        supuca_kernel,
        out_shape=(
            jax.ShapeDtypeStruct((Bp, LP), f32),
            jax.ShapeDtypeStruct((Bp, PD), f32),
            jax.ShapeDtypeStruct((Bp, CD), f32),
        ),
        grid_spec=pltpu.PrefetchScalarGridSpec(
            num_scalar_prefetch=0,
            grid=grid,
            in_specs=[
                pl.BlockSpec((TB, ZD), lambda i: (i, 0)),
                pl.BlockSpec((ZD, LP), lambda i: (0, 0)),   # weights stay resident
                pl.BlockSpec((LP, PD), lambda i: (0, 0)),
                pl.BlockSpec((LP, LP), lambda i: (0, 0)),
                pl.BlockSpec((LP, CD), lambda i: (0, 0)),
            ],
            out_specs=(
                pl.BlockSpec((TB, LP), lambda i: (i, 0)),
                pl.BlockSpec((TB, PD), lambda i: (i, 0)),
                pl.BlockSpec((TB, CD), lambda i: (i, 0)),
            ),
        ),
        compiler_params=pltpu.CompilerParams(
            dimension_semantics=("parallel",),
            vmem_limit_bytes=32 << 20),
        cost_estimate=pl.CostEstimate(
            flops=flops, transcendentals=0, bytes_accessed=bytes_accessed),
    )(Z, Wbd, Vproj, Vchain, Vbig2)

    # Unpack the lane-dense output slabs (wrapper-side XLA slices).
    WxX = lat[:B, 0:L]
    WyY = lat[:B, L:2 * L]
    VxWxX = proj[:B, 0:D]
    VyWyY = proj[:B, D:2 * D]
    VyWxX = proj[:B, 2 * D:3 * D]
    VxWyY = proj[:B, 3 * D:4 * D]
    chain_x = chain[:B, 0:D]
    chain_y = chain[:B, D:2 * D]

    # X, Y (flattened views) pass through unchanged, as in the torch module.
    return (WxX, WyY, VxWxX, VyWyY, VyWxX, VxWyY, chain_x, chain_y, Xf, Yf)


def _ref_forward(X, Y, Wx, Wy, Vx, Vy, img_dim=IMG_DIM):
    b = X.shape[0]
    Xf = X.reshape(b, img_dim).astype(jnp.float32)
    Yf = Y.reshape(b, img_dim).astype(jnp.float32)
    WxX = Xf @ Wx.T
    WyY = Yf @ Wy.T
    VxWxX = WxX @ Vx.T
    VyWyY = WyY @ Vy.T
    VyWxX = WxX @ Vy.T
    VxWyY = WyY @ Vx.T
    chain_x = (VyWxX @ Wy.T) @ Vx.T
    chain_y = (VxWyY @ Wx.T) @ Vy.T
    return (WxX, WyY, VxWxX, VyWyY, VyWxX, VxWyY, chain_x, chain_y, Xf, Yf)


if __name__ == "__main__":
    key = jax.random.PRNGKey(0)
    k_x, k_y, k_wx, k_wy, k_vx, k_vy = jax.random.split(key, 6)

    batch = 2
    # Inputs shaped like half-MNIST images, flattened inside forward.
    X = jax.random.normal(k_x, (batch, 14, 28), dtype=jnp.float32)
    Y = jax.random.normal(k_y, (batch, 14, 28), dtype=jnp.float32)

    # Deterministic parameter init (nn.Linear weight shape = (out, in)).
    scale_w = 1.0 / jnp.sqrt(IMG_DIM)
    scale_v = 1.0 / jnp.sqrt(LATENT_DIM)
    Wx = jax.random.uniform(k_wx, (LATENT_DIM, IMG_DIM), jnp.float32, -scale_w, scale_w)
    Wy = jax.random.uniform(k_wy, (LATENT_DIM, IMG_DIM), jnp.float32, -scale_w, scale_w)
    Vx = jax.random.uniform(k_vx, (IMG_DIM, LATENT_DIM), jnp.float32, -scale_v, scale_v)
    Vy = jax.random.uniform(k_vy, (IMG_DIM, LATENT_DIM), jnp.float32, -scale_v, scale_v)

    outs = supuca_forward(X, Y, Wx, Wy, Vx, Vy)
    outs = jax.block_until_ready(outs)

    refs = _ref_forward(X, Y, Wx, Wy, Vx, Vy)
    for o, r in zip(outs, refs):
        assert o.shape == r.shape, (o.shape, r.shape)
        # Chains use the (exact-in-real-arithmetic) Kyy/Kxx reassociation;
        # f32 rounding difference is << 1e-4 at these scales.
        assert jnp.allclose(o, r, atol=1e-4, rtol=1e-4), \
            float(jnp.max(jnp.abs(o - r)))

    print("KERNEL_OK")
</pallas_src>

<mosaic_0001>
module attributes {stable_mosaic.version = 11 : i64} {
  func.func @supuca_kernel(%arg0: i32, %arg1: memref<8x896xf32, #tpu.memory_space<vmem>>, %arg2: memref<896x128xf32, #tpu.memory_space<vmem>>, %arg3: memref<128x1664xf32, #tpu.memory_space<vmem>>, %arg4: memref<128x128xf32, #tpu.memory_space<vmem>>, %arg5: memref<128x896xf32, #tpu.memory_space<vmem>>, %arg6: memref<8x128xf32, #tpu.memory_space<vmem>>, %arg7: memref<8x1664xf32, #tpu.memory_space<vmem>>, %arg8: memref<8x896xf32, #tpu.memory_space<vmem>>) attributes {dimension_semantics = [#tpu.dimension_semantics<parallel>], iteration_bounds = array<i64: 1>, scalar_prefetch = 0 : i64, scratch_operands = 0 : i64, tpu.core_type = #tpu.core_type<tc>, window_params = [{transform_indices = @transform_0, window_bounds = array<i64: 8, 896>}, {pipeline_mode = #tpu.pipeline_mode<synchronous>, transform_indices = @transform_1, window_bounds = array<i64: 896, 128>}, {pipeline_mode = #tpu.pipeline_mode<synchronous>, transform_indices = @transform_2, window_bounds = array<i64: 128, 1664>}, {pipeline_mode = #tpu.pipeline_mode<synchronous>, transform_indices = @transform_3, window_bounds = array<i64: 128, 128>}, {pipeline_mode = #tpu.pipeline_mode<synchronous>, transform_indices = @transform_4, window_bounds = array<i64: 128, 896>}, {transform_indices = @transform_5, window_bounds = array<i64: 8, 128>}, {transform_indices = @transform_6, window_bounds = array<i64: 8, 1664>}, {transform_indices = @transform_7, window_bounds = array<i64: 8, 896>}]} {
    %c0 = arith.constant 0 : index
    %c0_0 = arith.constant 0 : index
    %0 = vector.load %arg1[%c0, %c0_0] : memref<8x896xf32, #tpu.memory_space<vmem>>, vector<8x896xf32>
    %c0_1 = arith.constant 0 : index
    %c0_2 = arith.constant 0 : index
    %1 = vector.load %arg2[%c0_1, %c0_2] : memref<896x128xf32, #tpu.memory_space<vmem>>, vector<896x128xf32>
    %cst = arith.constant dense<0.000000e+00> : vector<8x128xf32>
    %2 = tpu.matmul %0, %1, %cst {dimension_numbers = #tpu.dot_dimension_numbers<[1], [0], [0], [1], [0, 0, 1, 1], [], []>} : vector<8x896xf32>, vector<896x128xf32>, vector<8x128xf32> -> vector<8x128xf32>
    %c0_3 = arith.constant 0 : index
    %c0_4 = arith.constant 0 : index
    %3 = vector.load %arg6[%c0_3, %c0_4] : memref<8x128xf32, #tpu.memory_space<vmem>>, vector<8x128xf32>
    tpu.vector_store %arg6[%c0_3, %c0_4], %2 {strides = array<i32>} : memref<8x128xf32, #tpu.memory_space<vmem>>, vector<8x128xf32>,
    %c0_5 = arith.constant 0 : index
    %c0_6 = arith.constant 0 : index
    %4 = vector.load %arg3[%c0_5, %c0_6] : memref<128x1664xf32, #tpu.memory_space<vmem>>, vector<128x1664xf32>
    %cst_7 = arith.constant dense<0.000000e+00> : vector<8x1664xf32>
    %5 = tpu.matmul %2, %4, %cst_7 {dimension_numbers = #tpu.dot_dimension_numbers<[1], [0], [0], [1], [0, 0, 1, 1], [], []>} : vector<8x128xf32>, vector<128x1664xf32>, vector<8x1664xf32> -> vector<8x1664xf32>
    %c0_8 = arith.constant 0 : index
    %c0_9 = arith.constant 0 : index
    %6 = vector.load %arg7[%c0_8, %c0_9] : memref<8x1664xf32, #tpu.memory_space<vmem>>, vector<8x1664xf32>
    tpu.vector_store %arg7[%c0_8, %c0_9], %5 {strides = array<i32>} : memref<8x1664xf32, #tpu.memory_space<vmem>>, vector<8x1664xf32>,
    %c0_10 = arith.constant 0 : index
    %c0_11 = arith.constant 0 : index
    %7 = vector.load %arg4[%c0_10, %c0_11] : memref<128x128xf32, #tpu.memory_space<vmem>>, vector<128x128xf32>
    %cst_12 = arith.constant dense<0.000000e+00> : vector<8x128xf32>
    %8 = tpu.matmul %2, %7, %cst_12 {dimension_numbers = #tpu.dot_dimension_numbers<[1], [0], [0], [1], [0, 0, 1, 1], [], []>} : vector<8x128xf32>, vector<128x128xf32>, vector<8x128xf32> -> vector<8x128xf32>
    %c0_13 = arith.constant 0 : index
    %c0_14 = arith.constant 0 : index
    %9 = vector.load %arg5[%c0_13, %c0_14] : memref<128x896xf32, #tpu.memory_space<vmem>>, vector<128x896xf32>
    %cst_15 = arith.constant dense<0.000000e+00> : vector<8x896xf32>
    %10 = tpu.matmul %8, %9, %cst_15 {dimension_numbers = #tpu.dot_dimension_numbers<[1], [0], [0], [1], [0, 0, 1, 1], [], []>} : vector<8x128xf32>, vector<128x896xf32>, vector<8x896xf32> -> vector<8x896xf32>
    %c0_16 = arith.constant 0 : index
    %c0_17 = arith.constant 0 : index
    %11 = vector.load %arg8[%c0_16, %c0_17] : memref<8x896xf32, #tpu.memory_space<vmem>>, vector<8x896xf32>
    tpu.vector_store %arg8[%c0_16, %c0_17], %10 {strides = array<i32>} : memref<8x896xf32, #tpu.memory_space<vmem>>, vector<8x896xf32>,
    return
  }
  func.func @transform_0(%arg0: i32) -> (i32, i32) {
    %c0_i32 = arith.constant 0 : i32
    %c0_i32_0 = arith.constant 0 : i32
    return %arg0, %c0_i32 : i32, i32
  }
  func.func @transform_1(%arg0: i32) -> (i32, i32) {
    %c0_i32 = arith.constant 0 : i32
    %c0_i32_0 = arith.constant 0 : i32
    %c0_i32_1 = arith.constant 0 : i32
    return %c0_i32, %c0_i32_0 : i32, i32
  }
  func.func @transform_2(%arg0: i32) -> (i32, i32) {
    %c0_i32 = arith.constant 0 : i32
    %c0_i32_0 = arith.constant 0 : i32
    %c0_i32_1 = arith.constant 0 : i32
    return %c0_i32, %c0_i32_0 : i32, i32
  }
  func.func @transform_3(%arg0: i32) -> (i32, i32) {
    %c0_i32 = arith.constant 0 : i32
    %c0_i32_0 = arith.constant 0 : i32
    %c0_i32_1 = arith.constant 0 : i32
    return %c0_i32, %c0_i32_0 : i32, i32
  }
  func.func @transform_4(%arg0: i32) -> (i32, i32) {
    %c0_i32 = arith.constant 0 : i32
    %c0_i32_0 = arith.constant 0 : i32
    %c0_i32_1 = arith.constant 0 : i32
    return %c0_i32, %c0_i32_0 : i32, i32
  }
  func.func @transform_5(%arg0: i32) -> (i32, i32) {
    %c0_i32 = arith.constant 0 : i32
    %c0_i32_0 = arith.constant 0 : i32
    return %arg0, %c0_i32 : i32, i32
  }
  func.func @transform_6(%arg0: i32) -> (i32, i32) {
    %c0_i32 = arith.constant 0 : i32
    %c0_i32_0 = arith.constant 0 : i32
    return %arg0, %c0_i32 : i32, i32
  }
  func.func @transform_7(%arg0: i32) -> (i32, i32) {
    %c0_i32 = arith.constant 0 : i32
    %c0_i32_0 = arith.constant 0 : i32
    return %arg0, %c0_i32 : i32, i32
  }
}

</mosaic_0001>

<bundles_post_ra>
// kernel: supuca_forward.1
= control target key start
LH: loop header
LB: loop body
LE: loop exit
PB: predicated region body
PF: predicated region fallthrough
CT: control target
= control target key end

     0   :  { %s2556_s1 = inlined_call_operand.vmem [shape: f32[896,128], index: 1, kind: input, shape index: {}]   ;;  %s2557_s0 = inlined_call_operand.vmem [shape: f32[8,896], index: 0, kind: input, shape index: {}]   ;;  %s2558_s2 = inlined_call_operand.vmem [shape: f32[128,1664], index: 2, kind: input, shape index: {}]   ;;  %s2559_s5 = inlined_call_operand.vmem [shape: f32[8,128], index: 5, kind: output, shape index: {0}]   ;;  %s2560_s3 = inlined_call_operand.vmem [shape: f32[128,128], index: 3, kind: input, shape index: {}]   ;;  %s2561_s4 = inlined_call_operand.vmem [shape: f32[128,896], index: 4, kind: input, shape index: {}]   ;;  %s2562_s6 = inlined_call_operand.vmem [shape: f32[8,1664], index: 6, kind: output, shape index: {1}]   ;;  %s2563_s7 = inlined_call_operand.vmem [shape: f32[8,896], index: 7, kind: output, shape index: {2}]  }
   0x1   :  { %v45_v0 = vld [vmem:[%s2556_s1 + $0x78] sm:$0xff]  ;;  %v44_v2 = vld [vmem:[%s2556_s1 + $0x70] sm:$0xff]  ;;  %v43_v5 = vld [vmem:[%s2556_s1 + $0x68] sm:$0xff] }
   0x2   :  { %v77_v1 = vld [vmem:[%s2556_s1 + $0x178] sm:$0xff]  ;;  %142 = vmatpush.msra.mxu0 %v45_v0  ;;  %v76_v4 = vld [vmem:[%s2556_s1 + $0x170] sm:$0xff]  ;;  %v75_v7 = vld [vmem:[%s2556_s1 + $0x168] sm:$0xff] }
   0x3   :  { %182 = vmatpush.msra.mxu2 %v77_v1  ;;  %v61_v3 = vld [vmem:[%s2556_s1 + $0xf8] sm:$0xff]  ;;  %v60_v6 = vld [vmem:[%s2556_s1 + $0xf0] sm:$0xff]  ;;  %v59_v8 = vld [vmem:[%s2556_s1 + $0xe8] sm:$0xff] }
   0x4   :  { %162 = vmatpush.msra.mxu1 %v61_v3  ;;  %143 = vmatpush.msra.mxu0 %v44_v2  ;;  %v42_v9 = vld [vmem:[%s2556_s1 + $0x60] sm:$0xff]  ;;  %v41_v12 = vld [vmem:[%s2556_s1 + $0x58] sm:$0xff]  ;;  %v40_v15 = vld [vmem:[%s2556_s1 + $0x50] sm:$0xff] }
   0x5   :  { %183 = vmatpush.msra.mxu2 %v76_v4  ;;  %v74_v10 = vld [vmem:[%s2556_s1 + $0x160] sm:$0xff]  ;;  %v73_v13 = vld [vmem:[%s2556_s1 + $0x158] sm:$0xff]  ;;  %v72_v16 = vld [vmem:[%s2556_s1 + $0x150] sm:$0xff] }
   0x6   :  { %163 = vmatpush.msra.mxu1 %v60_v6  ;;  %144 = vmatpush.msra.mxu0 %v43_v5  ;;  %v58_v11 = vld [vmem:[%s2556_s1 + $0xe0] sm:$0xff]  ;;  %v57_v14 = vld [vmem:[%s2556_s1 + $0xd8] sm:$0xff]  ;;  %v56_v17 = vld [vmem:[%s2556_s1 + $0xd0] sm:$0xff] }
   0x7   :  { %184 = vmatpush.msra.mxu2 %v75_v7  ;;  %v39_v18 = vld [vmem:[%s2556_s1 + $0x48] sm:$0xff]  ;;  %v93_v21 = vld [vmem:[%s2556_s1 + $0x1f8] sm:$0xff]  ;;  %v38_v22 = vld [vmem:[%s2556_s1 + $0x40] sm:$0xff] }
   0x8   :  { %164 = vmatpush.msra.mxu1 %v59_v8  ;;  %145 = vmatpush.msra.mxu0 %v42_v9  ;;  %v71_v19 = vld [vmem:[%s2556_s1 + $0x148] sm:$0xff]  ;;  %v70_v23 = vld [vmem:[%s2556_s1 + $0x140] sm:$0xff]  ;;  %v92_v25 = vld [vmem:[%s2556_s1 + $0x1f0] sm:$0xff] }
   0x9   :  { %185 = vmatpush.msra.mxu2 %v74_v10  ;;  %v55_v20 = vld [vmem:[%s2556_s1 + $0xc8] sm:$0xff]  ;;  %202 = vmatpush.msra.mxu3 %v93_v21  ;;  %v54_v24 = vld [vmem:[%s2556_s1 + $0xc0] sm:$0xff]  ;;  %v37_v26 = vld [vmem:[%s2556_s1 + $0x38] sm:$0xff] }
   0xa   :  { %165 = vmatpush.msra.mxu1 %v58_v11  ;;  %146 = vmatpush.msra.mxu0 %v41_v12  ;;  %v69_v27 = vld [vmem:[%s2556_s1 + $0x138] sm:$0xff]  ;;  %v91_v28 = vld [vmem:[%s2556_s1 + $0x1e8] sm:$0xff]  ;;  %v90_v30 = vld [vmem:[%s2556_s1 + $0x1e0] sm:$0xff] }
   0xb   :  { %186 = vmatpush.msra.mxu2 %v73_v13  ;;  %203 = vmatpush.msra.mxu3 %v92_v25  ;;  %v53_v29 = vld [vmem:[%s2556_s1 + $0xb8] sm:$0xff]  ;;  %v36_v31 = vld [vmem:[%s2556_s1 + $0x30] sm:$0xff]  ;;  %v35_v35 = vld [vmem:[%s2556_s1 + $0x28] sm:$0xff] }
   0xc   :  { %166 = vmatpush.msra.mxu1 %v57_v14  ;;  %147 = vmatpush.msra.mxu0 %v40_v15  ;;  %v68_v32 = vld [vmem:[%s2556_s1 + $0x130] sm:$0xff]  ;;  %v89_v34 = vld [vmem:[%s2556_s1 + $0x1d8] sm:$0xff]  ;;  %v67_v36 = vld [vmem:[%s2556_s1 + $0x128] sm:$0xff] }
   0xd   :  { %187 = vmatpush.msra.mxu2 %v72_v16  ;;  %204 = vmatpush.msra.mxu3 %v91_v28  ;;  %v52_v33 = vld [vmem:[%s2556_s1 + $0xb0] sm:$0xff]  ;;  %v51_v37 = vld [vmem:[%s2556_s1 + $0xa8] sm:$0xff]  ;;  %v34_v39 = vld [vmem:[%s2556_s1 + $0x20] sm:$0xff] }
   0xe   :  { %167 = vmatpush.msra.mxu1 %v56_v17  ;;  %148 = vmatpush.msra.mxu0 %v39_v18  ;;  %v88_v38 = vld [vmem:[%s2556_s1 + $0x1d0] sm:$0xff]  ;;  %v66_v40 = vld [vmem:[%s2556_s1 + $0x120] sm:$0xff]  ;;  %v87_v42 = vld [vmem:[%s2556_s1 + $0x1c8] sm:$0xff] }
   0xf   :  { %188 = vmatpush.msra.mxu2 %v71_v19  ;;  %205 = vmatpush.msra.mxu3 %v90_v30  ;;  %v50_v41 = vld [vmem:[%s2556_s1 + $0xa0] sm:$0xff]  ;;  %v33_v43 = vld [vmem:[%s2556_s1 + $0x18] sm:$0xff]  ;;  %v32_v47 = vld [vmem:[%s2556_s1 + $0x10] sm:$0xff] }
  0x10   :  { %168 = vmatpush.msra.mxu1 %v55_v20  ;;  %149 = vmatpush.msra.mxu0 %v38_v22  ;;  %v65_v44 = vld [vmem:[%s2556_s1 + $0x118] sm:$0xff]  ;;  %v86_v46 = vld [vmem:[%s2556_s1 + $0x1c0] sm:$0xff]  ;;  %v64_v48 = vld [vmem:[%s2556_s1 + $0x110] sm:$0xff] }
  0x11   :  { %189 = vmatpush.msra.mxu2 %v70_v23  ;;  %206 = vmatpush.msra.mxu3 %v89_v34  ;;  %v49_v45 = vld [vmem:[%s2556_s1 + $0x98] sm:$0xff]  ;;  %v48_v49 = vld [vmem:[%s2556_s1 + $0x90] sm:$0xff]  ;;  %v31_v51 = vld [vmem:[%s2556_s1 + $0x8] sm:$0xff] }
  0x12   :  { %169 = vmatpush.msra.mxu1 %v54_v24  ;;  %150 = vmatpush.msra.mxu0 %v37_v26  ;;  %v85_v50 = vld [vmem:[%s2556_s1 + $0x1b8] sm:$0xff]  ;;  %v63_v52 = vld [vmem:[%s2556_s1 + $0x108] sm:$0xff]  ;;  %v84_v54 = vld [vmem:[%s2556_s1 + $0x1b0] sm:$0xff] }
  0x13   :  { %190 = vmatpush.msra.mxu2 %v69_v27  ;;  %207 = vmatpush.msra.mxu3 %v88_v38  ;;  %v47_v53 = vld [vmem:[%s2556_s1 + $0x88] sm:$0xff]  ;;  %v30_v55 = vld [vmem:[%s2556_s1] sm:$0xff]  ;;  %v109_v57 = vld [vmem:[%s2556_s1 + $0x278] sm:$0xff] }
  0x14   :  { %170 = vmatpush.msra.mxu1 %v53_v29  ;;  %151 = vmatpush.msra.mxu0 %v36_v31  ;;  %v62_v56 = vld [vmem:[%s2556_s1 + $0x100] sm:$0xff]  ;;  %v141_v58 = vld [vmem:[%s2556_s1 + $0x378] sm:$0xff]  ;;  %v83_v60 = vld [vmem:[%s2556_s1 + $0x1a8] sm:$0xff] }
  0x15   :  { %191 = vmatpush.msra.mxu2 %v68_v32  ;;  %208 = vmatpush.msra.mxu3 %v87_v42  ;;  %v46_v59 = vld [vmem:[%s2556_s1 + $0x80] sm:$0xff]  ;;  %v108_v61 = vld [vmem:[%s2556_s1 + $0x270] sm:$0xff]  ;;  %v125_v62 = vld [vmem:[%s2556_s1 + $0x2f8] sm:$0xff] }
  0x16   :  { %171 = vmatpush.msra.mxu1 %v52_v33  ;;  %152 = vmatpush.msra.mxu0 %v35_v35  ;;  %v140_v63 = vld [vmem:[%s2556_s1 + $0x370] sm:$0xff]  ;;  %v82_v0 = vld [vmem:[%s2556_s1 + $0x1a0] sm:$0xff]  ;;  %v107_v1 = vld [vmem:[%s2556_s1 + $0x268] sm:$0xff] }
  0x17   :  { %192 = vmatpush.msra.mxu2 %v67_v36  ;;  %209 = vmatpush.msra.mxu3 %v86_v46  ;;  %v124_v2 = vld [vmem:[%s2556_s1 + $0x2f0] sm:$0xff]  ;;  %v139_v3 = vld [vmem:[%s2556_s1 + $0x368] sm:$0xff]  ;;  %v81_v4 = vld [vmem:[%s2556_s1 + $0x198] sm:$0xff] }
  0x18   :  { %172 = vmatpush.msra.mxu1 %v51_v37  ;;  %153 = vmatpush.msra.mxu0 %v34_v39  ;;  %v106_v5 = vld [vmem:[%s2556_s1 + $0x260] sm:$0xff]  ;;  %v123_v6 = vld [vmem:[%s2556_s1 + $0x2e8] sm:$0xff]  ;;  %v80_v8 = vld [vmem:[%s2556_s1 + $0x190] sm:$0xff] }
  0x19   :  { %193 = vmatpush.msra.mxu2 %v66_v40  ;;  %210 = vmatpush.msra.mxu3 %v85_v50  ;;  %v138_v7 = vld [vmem:[%s2556_s1 + $0x360] sm:$0xff]  ;;  %v105_v9 = vld [vmem:[%s2556_s1 + $0x258] sm:$0xff]  ;;  %v79_v12 = vld [vmem:[%s2556_s1 + $0x188] sm:$0xff] }
  0x1a   :  { %173 = vmatpush.msra.mxu1 %v50_v41  ;;  %154 = vmatpush.msra.mxu0 %v33_v43  ;;  %v122_v10 = vld [vmem:[%s2556_s1 + $0x2e0] sm:$0xff]  ;;  %v137_v11 = vld [vmem:[%s2556_s1 + $0x358] sm:$0xff]  ;;  %v104_v13 = vld [vmem:[%s2556_s1 + $0x250] sm:$0xff] }
  0x1b   :  { %194 = vmatpush.msra.mxu2 %v65_v44  ;;  %211 = vmatpush.msra.mxu3 %v84_v54  ;;  %v121_v14 = vld [vmem:[%s2556_s1 + $0x2d8] sm:$0xff]  ;;  %v136_v15 = vld [vmem:[%s2556_s1 + $0x350] sm:$0xff]  ;;  %v78_v16 = vld [vmem:[%s2556_s1 + $0x180] sm:$0xff] }
  0x1c   :  { %174 = vmatpush.msra.mxu1 %v49_v45  ;;  %155 = vmatpush.msra.mxu0 %v32_v47  ;;  %v103_v17 = vld [vmem:[%s2556_s1 + $0x248] sm:$0xff]  ;;  %v120_v18 = vld [vmem:[%s2556_s1 + $0x2d0] sm:$0xff]  ;;  %v23_v20 = vld [vmem:[%s2557_s0] sm:$0xff] }
  0x1d   :  { %195 = vmatpush.msra.mxu2 %v64_v48  ;;  %212 = vmatpush.msra.mxu3 %v83_v60  ;;  %v135_v19 = vld [vmem:[%s2556_s1 + $0x348] sm:$0xff]  ;;  %v102_v21 = vld [vmem:[%s2556_s1 + $0x240] sm:$0xff]  ;;  %v26_v24 = vld [vmem:[%s2557_s0 + $0x18] sm:$0xff] }
  0x1e   :  { %175 = vmatpush.msra.mxu1 %v48_v49  ;;  %156 = vmatpush.msra.mxu0 %v31_v51  ;;  %v119_v22 = vld [vmem:[%s2556_s1 + $0x2c8] sm:$0xff]  ;;  %v134_v23 = vld [vmem:[%s2556_s1 + $0x340] sm:$0xff]  ;;  %v101_v25 = vld [vmem:[%s2556_s1 + $0x238] sm:$0xff] }
  0x1f   :  { %196 = vmatpush.msra.mxu2 %v63_v52  ;;  %213 = vmatpush.msra.mxu3 %v82_v0  ;;  %v118_v26 = vld [vmem:[%s2556_s1 + $0x2c0] sm:$0xff]  ;;  %v133_v27 = vld [vmem:[%s2556_s1 + $0x338] sm:$0xff]  ;;  %v24_v28 = vld [vmem:[%s2557_s0 + $0x8] sm:$0xff] }
  0x20   :  { %176 = vmatpush.msra.mxu1 %v47_v53  ;;  %157 = vmatpush.msra.mxu0 %v30_v55  ;;  %v100_v29 = vld [vmem:[%s2556_s1 + $0x230] sm:$0xff]  ;;  %v117_v30 = vld [vmem:[%s2556_s1 + $0x2b8] sm:$0xff]  ;;  %v99_v33 = vld [vmem:[%s2556_s1 + $0x228] sm:$0xff] }
  0x21   :  { %197 = vmatpush.msra.mxu2 %v62_v56  ;;  %214 = vmatpush.msra.mxu3 %v81_v4  ;;  %v132_v31 = vld [vmem:[%s2556_s1 + $0x330] sm:$0xff]  ;;  %v478_v32 = vld [vmem:[%s2558_s2 + $0x618] sm:$0xff]  ;;  %v131_v35 = vld [vmem:[%s2556_s1 + $0x328] sm:$0xff] }
  0x22   :  { %222 = vmatpush.msrb.mxu0 %v109_v57  ;;  %177 = vmatpush.msra.mxu1 %v46_v59  ;;  %v116_v34 = vld [vmem:[%s2556_s1 + $0x2b0] sm:$0xff]  ;;  %v98_v38 = vld [vmem:[%s2556_s1 + $0x220] sm:$0xff]  ;;  %v115_v39 = vld [vmem:[%s2556_s1 + $0x2a8] sm:$0xff] }
  0x23   :  { %262 = vmatpush.msrb.mxu2 %v141_v58  ;;  %215 = vmatpush.msra.mxu3 %v80_v8  ;;  %v465_v36 = vld [vmem:[%s2558_s2 + $0x5b0] sm:$0xff]  ;;  %v130_v40 = vld [vmem:[%s2556_s1 + $0x320] sm:$0xff]  ;;  %v97_v41 = vld [vmem:[%s2556_s1 + $0x218] sm:$0xff] }
  0x24   :  { %223 = vmatpush.msrb.mxu0 %v108_v61  ;;  %242 = vmatpush.msrb.mxu1 %v125_v62  ;;  %v25_v37 = vld [vmem:[%s2557_s0 + $0x10] sm:$0xff]  ;;  %v452_v42 = vld [vmem:[%s2558_s2 + $0x548] sm:$0xff]  ;;  %v114_v43 = vld [vmem:[%s2556_s1 + $0x2a0] sm:$0xff] }
  0x25   :  { %263 = vmatpush.msrb.mxu2 %v140_v63  ;;  %216 = vmatpush.msra.mxu3 %v79_v12  ;;  %v129_v44 = vld [vmem:[%s2556_s1 + $0x318] sm:$0xff]  ;;  %v96_v45 = vld [vmem:[%s2556_s1 + $0x210] sm:$0xff]  ;;  %v439_v46 = vld [vmem:[%s2558_s2 + $0x4e0] sm:$0xff] }
  0x26   :  { %224 = vmatpush.msrb.mxu0 %v107_v1  ;;  %243 = vmatpush.msrb.mxu1 %v124_v2  ;;  %v113_v47 = vld [vmem:[%s2556_s1 + $0x298] sm:$0xff]  ;;  %v128_v48 = vld [vmem:[%s2556_s1 + $0x310] sm:$0xff]  ;;  %v95_v49 = vld [vmem:[%s2556_s1 + $0x208] sm:$0xff] }
  0x27   :  { %264 = vmatpush.msrb.mxu2 %v139_v3  ;;  %217 = vmatpush.msra.mxu3 %v78_v16  ;;  %v426_v50 = vld [vmem:[%s2558_s2 + $0x478] sm:$0xff]  ;;  %v112_v51 = vld [vmem:[%s2556_s1 + $0x290] sm:$0xff]  ;;  %v127_v52 = vld [vmem:[%s2556_s1 + $0x308] sm:$0xff] }
  0x28   :  { %225 = vmatpush.msrb.mxu0 %v106_v5  ;;  %244 = vmatpush.msrb.mxu1 %v123_v6  ;;  %v94_v53 = vld [vmem:[%s2556_s1 + $0x200] sm:$0xff]  ;;  %v413_v54 = vld [vmem:[%s2558_s2 + $0x410] sm:$0xff]  ;;  %v111_v55 = vld [vmem:[%s2556_s1 + $0x288] sm:$0xff] }
  0x29   :  { %265 = vmatpush.msrb.mxu2 %v138_v7  ;;  %158 = vmatmul.f32.vlgmr.msra.gmra.mxu0 %v23_v20  ;;  %v126_v56 = vld [vmem:[%s2556_s1 + $0x300] sm:$0xff]  ;;  %v29_v58 = vld [vmem:[%s2557_s0 + $0x30] sm:$0xff]  ;;  %v28_v61 = vld [vmem:[%s2557_s0 + $0x28] sm:$0xff] }
  0x2a   :  { %226 = vmatpush.msrb.mxu0 %v105_v9  ;;  %245 = vmatpush.msrb.mxu1 %v122_v10  ;;  %v27_v57 = vld [vmem:[%s2557_s0 + $0x20] sm:$0xff]  ;;  %v481_v62 = vld [vmem:[%s2558_s2 + $0x630] sm:$0xff]  ;;  %v480_v63 = vld [vmem:[%s2558_s2 + $0x628] sm:$0xff] }
  0x2b   :  { %266 = vmatpush.msrb.mxu2 %v137_v11  ;;  %218 = vmatmul.f32.vlgmr.msra.gmra.mxu3 %v26_v24  ;;  %v110_v59 = vld [vmem:[%s2556_s1 + $0x280] sm:$0xff]  ;;  %v466_v0 = vld [vmem:[%s2558_s2 + $0x5b8] sm:$0xff]  ;;  %v468_v1 = vld [vmem:[%s2558_s2 + $0x5c8] sm:$0xff] }
  0x2c   :  { %227 = vmatpush.msrb.mxu0 %v104_v13  ;;  %246 = vmatpush.msrb.mxu1 %v121_v14  ;;  %v479_v60 = vld [vmem:[%s2558_s2 + $0x620] sm:$0xff]  ;;  %v400_v2 = vld [vmem:[%s2558_s2 + $0x3a8] sm:$0xff]  ;;  %v453_v4 = vld [vmem:[%s2558_s2 + $0x550] sm:$0xff] }
  0x2d   :  { %267 = vmatpush.msrb.mxu2 %v136_v15  ;;  %178 = vmatmul.f32.vlgmr.msra.gmra.mxu1 %v24_v28  ;;  %v467_v3 = vld [vmem:[%s2558_s2 + $0x5c0] sm:$0xff]  ;;  %v454_v7 = vld [vmem:[%s2558_s2 + $0x558] sm:$0xff]  ;;  %v440_v8 = vld [vmem:[%s2558_s2 + $0x4e8] sm:$0xff] }
  0x2e   :  { %228 = vmatpush.msrb.mxu0 %v103_v17  ;;  %247 = vmatpush.msrb.mxu1 %v120_v18  ;;  %v455_v5 = vld [vmem:[%s2558_s2 + $0x560] sm:$0xff]  ;;  %v442_v9 = vld [vmem:[%s2558_s2 + $0x4f8] sm:$0xff]  ;;  %v441_v11 = vld [vmem:[%s2558_s2 + $0x4f0] sm:$0xff] }
  0x2f   :  { %268 = vmatpush.msrb.mxu2 %v135_v19  ;;  %491 = vmatpush.msrb.mxu3 %v478_v32  ;;  %v387_v6 = vld [vmem:[%s2558_s2 + $0x340] sm:$0xff]  ;;  %v374_v10 = vld [vmem:[%s2558_s2 + $0x2d8] sm:$0xff]  ;;  %v429_v13 = vld [vmem:[%s2558_s2 + $0x490] sm:$0xff] }
  0x30   :  { %229 = vmatpush.msrb.mxu0 %v102_v21  ;;  %248 = vmatpush.msrb.mxu1 %v119_v22  ;;  %v427_v12 = vld [vmem:[%s2558_s2 + $0x480] sm:$0xff]  ;;  %v361_v14 = vld [vmem:[%s2558_s2 + $0x270] sm:$0xff]  ;;  %v428_v15 = vld [vmem:[%s2558_s2 + $0x488] sm:$0xff] }
  0x31   :  { %269 = vmatpush.msrb.mxu2 %v134_v23  ;;  %492 = vmatpush.msrb.mxu3 %v465_v36  ;;  %v414_v16 = vld [vmem:[%s2558_s2 + $0x418] sm:$0xff]  ;;  %v416_v17 = vld [vmem:[%s2558_s2 + $0x428] sm:$0xff]  ;;  %v415_v19 = vld [vmem:[%s2558_s2 + $0x420] sm:$0xff] }
  0x32   :  { %230 = vmatpush.msrb.mxu0 %v101_v25  ;;  %249 = vmatpush.msrb.mxu1 %v118_v26  ;;  %v348_v18 = vld [vmem:[%s2558_s2 + $0x208] sm:$0xff]  ;;  %v401_v20 = vld [vmem:[%s2558_s2 + $0x3b0] sm:$0xff]  ;;  %v403_v21 = vld [vmem:[%s2558_s2 + $0x3c0] sm:$0xff] }
  0x33   :  { %270 = vmatpush.msrb.mxu2 %v133_v27  ;;  %493 = vmatpush.msrb.mxu3 %v452_v42  ;;  %v335_v22 = vld [vmem:[%s2558_s2 + $0x1a0] sm:$0xff]  ;;  %v402_v23 = vld [vmem:[%s2558_s2 + $0x3b8] sm:$0xff]  ;;  %v388_v24 = vld [vmem:[%s2558_s2 + $0x348] sm:$0xff] }
  0x34   :  { %231 = vmatpush.msrb.mxu0 %v100_v29  ;;  %250 = vmatpush.msrb.mxu1 %v117_v30  ;;  %v390_v25 = vld [vmem:[%s2558_s2 + $0x358] sm:$0xff]  ;;  %v389_v27 = vld [vmem:[%s2558_s2 + $0x350] sm:$0xff]  ;;  %v375_v28 = vld [vmem:[%s2558_s2 + $0x2e0] sm:$0xff] }
  0x35   :  { %271 = vmatpush.msrb.mxu2 %v132_v31  ;;  %494 = vmatpush.msrb.mxu3 %v439_v46  ;;  %v322_v26 = vld [vmem:[%s2558_s2 + $0x138] sm:$0xff]  ;;  %v377_v29 = vld [vmem:[%s2558_s2 + $0x2f0] sm:$0xff]  ;;  %v376_v31 = vld [vmem:[%s2558_s2 + $0x2e8] sm:$0xff] }
  0x36   :  { %232 = vmatpush.msrb.mxu0 %v99_v33  ;;  %251 = vmatpush.msrb.mxu1 %v116_v34  ;;  %v309_v30 = vld [vmem:[%s2558_s2 + $0xd0] sm:$0xff]  ;;  %v362_v32 = vld [vmem:[%s2558_s2 + $0x278] sm:$0xff]  ;;  %v364_v33 = vld [vmem:[%s2558_s2 + $0x288] sm:$0xff] }
  0x37   :  { %272 = vmatpush.msrb.mxu2 %v131_v35  ;;  %495 = vmatpush.msrb.mxu3 %v426_v50  ;;  %v296_v34 = vld [vmem:[%s2558_s2 + $0x68] sm:$0xff]  ;;  %v363_v35 = vld [vmem:[%s2558_s2 + $0x280] sm:$0xff]  ;;  %v349_v36 = vld [vmem:[%s2558_s2 + $0x210] sm:$0xff] }
  0x38   :  { %198 = vmatmul.f32.vlgmr.msra.gmra.mxu2 %v25_v37  ;;  %233 = vmatpush.msrb.mxu0 %v98_v38  ;;  %v351_v37 = vld [vmem:[%s2558_s2 + $0x220] sm:$0xff]  ;;  %v482_v42 = vld [vmem:[%s2558_s2 + $0x638] sm:$0xff]  ;;  %v469_v46 = vld [vmem:[%s2558_s2 + $0x5d0] sm:$0xff] }
  0x39   :  { %252 = vmatpush.msrb.mxu1 %v115_v39  ;;  %273 = vmatpush.msrb.mxu2 %v130_v40  ;;  %v283_v38 = vld [vmem:[%s2558_s2] sm:$0xff]  ;;  %v350_v39 = vld [vmem:[%s2558_s2 + $0x218] sm:$0xff]  ;;  %v336_v40 = vld [vmem:[%s2558_s2 + $0x1a8] sm:$0xff] }
  0x3a   :  { %234 = vmatpush.msrb.mxu0 %v97_v41  ;;  %496 = vmatpush.msrb.mxu3 %v413_v54  ;;  %v338_v41 = vld [vmem:[%s2558_s2 + $0x1b8] sm:$0xff]  ;;  %v456_v50 = vld [vmem:[%s2558_s2 + $0x568] sm:$0xff]  ;;  %v443_v54 = vld [vmem:[%s2558_s2 + $0x500] sm:$0xff] }
  0x3b   :  { %253 = vmatpush.msrb.mxu1 %v114_v43  ;;  %274 = vmatpush.msrb.mxu2 %v129_v44  ;;  %v337_v43 = vld [vmem:[%s2558_s2 + $0x1b0] sm:$0xff]  ;;  %v323_v44 = vld [vmem:[%s2558_s2 + $0x140] sm:$0xff] }
  0x3c   :  { %235 = vmatpush.msrb.mxu0 %v96_v45  ;;  %497 = vmatpush.msrb.mxu3 %v400_v2  ;;  %v325_v45 = vld [vmem:[%s2558_s2 + $0x150] sm:$0xff] }
  0x3d   :  { %254 = vmatpush.msrb.mxu1 %v113_v47  ;;  %275 = vmatpush.msrb.mxu2 %v128_v48  ;;  %v324_v47 = vld [vmem:[%s2558_s2 + $0x148] sm:$0xff]  ;;  %v310_v48 = vld [vmem:[%s2558_s2 + $0xd8] sm:$0xff]  ;;  %v457_v2 = vld [vmem:[%s2558_s2 + $0x570] sm:$0xff] }
  0x3e   :  { %236 = vmatpush.msrb.mxu0 %v95_v49  ;;  %498 = vmatpush.msrb.mxu3 %v387_v6  ;;  %v312_v49 = vld [vmem:[%s2558_s2 + $0xe8] sm:$0xff] }
  0x3f   :  { %255 = vmatpush.msrb.mxu1 %v112_v51  ;;  %276 = vmatpush.msrb.mxu2 %v127_v52  ;;  %v311_v51 = vld [vmem:[%s2558_s2 + $0xe0] sm:$0xff]  ;;  %v297_v52 = vld [vmem:[%s2558_s2 + $0x70] sm:$0xff]  ;;  %v444_v6 = vld [vmem:[%s2558_s2 + $0x508] sm:$0xff] }
  0x40   :  { %237 = vmatpush.msrb.mxu0 %v94_v53  ;;  %499 = vmatpush.msrb.mxu3 %v374_v10  ;;  %v299_v53 = vld [vmem:[%s2558_s2 + $0x80] sm:$0xff] }
  0x41   :  { %256 = vmatpush.msrb.mxu1 %v111_v55  ;;  %277 = vmatpush.msrb.mxu2 %v126_v56  ;;  %v298_v55 = vld [vmem:[%s2558_s2 + $0x78] sm:$0xff]  ;;  %v284_v56 = vld [vmem:[%s2558_s2 + $0x8] sm:$0xff]  ;;  %v431_v10 = vld [vmem:[%s2558_s2 + $0x4a0] sm:$0xff] }
  0x42   :  { %238 = vmatmul.f32.vlgmr.msrb.gmra.mxu0 %v27_v57  ;;  %278 = vmatmul.f32.vlgmr.msrb.gmra.mxu2 %v29_v58  ;;  %v286_v57 = vld [vmem:[%s2558_s2 + $0x18] sm:$0xff]  ;;  %v483_v58 = vld [vmem:[%s2558_s2 + $0x640] sm:$0xff] }
  0x43   :  { %257 = vmatpush.msrb.mxu1 %v110_v59  ;;  %511 = vmatpush.msra.mxu0 %v479_v60  ;;  %v285_v59 = vld [vmem:[%s2558_s2 + $0x10] sm:$0xff] }
  0x44   :  { %258 = vmatmul.f32.vlgmr.msrb.gmra.mxu1 %v28_v61  ;;  %551 = vmatpush.msra.mxu2 %v481_v62  ;;  %v485_v60 = vld [vmem:[%s2558_s2 + $0x650] sm:$0xff]  ;;  %v484_v61 = vld [vmem:[%s2558_s2 + $0x648] sm:$0xff]  ;;  %v470_v62 = vld [vmem:[%s2558_s2 + $0x5d8] sm:$0xff] }
  0x45   :  { %531 = vmatpush.msra.mxu1 %v480_v63  ;;  %512 = vmatpush.msra.mxu0 %v466_v0  ;;  %v472_v63 = vld [vmem:[%s2558_s2 + $0x5e8] sm:$0xff]  ;;  %v430_v0 = vld [vmem:[%s2558_s2 + $0x498] sm:$0xff] }
  0x46   :  { %552 = vmatpush.msra.mxu2 %v468_v1  ;;  %500 = vmatpush.msrb.mxu3 %v361_v14  ;;  %v471_v1 = vld [vmem:[%s2558_s2 + $0x5e0] sm:$0xff]  ;;  %v420_v14 = vld [vmem:[%s2558_s2 + $0x448] sm:$0xff] }
  0x47   :  { %532 = vmatpush.msra.mxu1 %v467_v3  ;;  %513 = vmatpush.msra.mxu0 %v453_v4  ;;  %v459_v3 = vld [vmem:[%s2558_s2 + $0x580] sm:$0xff]  ;;  %v417_v4 = vld [vmem:[%s2558_s2 + $0x430] sm:$0xff] }
  0x48   :  { %553 = vmatpush.msra.mxu2 %v455_v5  ;;  %501 = vmatpush.msrb.mxu3 %v348_v18  ;;  %v458_v5 = vld [vmem:[%s2558_s2 + $0x578] sm:$0xff] }
  0x49   :  { %533 = vmatpush.msra.mxu1 %v454_v7  ;;  %514 = vmatpush.msra.mxu0 %v440_v8  ;;  %v446_v7 = vld [vmem:[%s2558_s2 + $0x518] sm:$0xff]  ;;  %v404_v8 = vld [vmem:[%s2558_s2 + $0x3c8] sm:$0xff] }
  0x4a   :  { %554 = vmatpush.msra.mxu2 %v442_v9  ;;  %502 = vmatpush.msrb.mxu3 %v335_v22  ;;  %v445_v9 = vld [vmem:[%s2558_s2 + $0x510] sm:$0xff]  ;;  %v406_v18 = vld [vmem:[%s2558_s2 + $0x3d8] sm:$0xff] }
  0x4b   :  { %534 = vmatpush.msra.mxu1 %v441_v11  ;;  %515 = vmatpush.msra.mxu0 %v427_v12  ;;  %v433_v11 = vld [vmem:[%s2558_s2 + $0x4b0] sm:$0xff]  ;;  %v432_v12 = vld [vmem:[%s2558_s2 + $0x4a8] sm:$0xff]  ;;  %v394_v22 = vld [vmem:[%s2558_s2 + $0x378] sm:$0xff] }
  0x4c   :  { %555 = vmatpush.msra.mxu2 %v429_v13  ;;  %503 = vmatpush.msrb.mxu3 %v322_v26  ;;  %v418_v13 = vld [vmem:[%s2558_s2 + $0x438] sm:$0xff]  ;;  %v381_v26 = vld [vmem:[%s2558_s2 + $0x310] sm:$0xff] }
  0x4d   :  { %535 = vmatpush.msra.mxu1 %v428_v15  ;;  %516 = vmatpush.msra.mxu0 %v414_v16  ;;  %v419_v15 = vld [vmem:[%s2558_s2 + $0x440] sm:$0xff]  ;;  %v405_v16 = vld [vmem:[%s2558_s2 + $0x3d0] sm:$0xff] }
  0x4e   :  { %556 = vmatpush.msra.mxu2 %v416_v17  ;;  %504 = vmatpush.msrb.mxu3 %v309_v30  ;;  %v407_v17 = vld [vmem:[%s2558_s2 + $0x3e0] sm:$0xff]  ;;  %v368_v30 = vld [vmem:[%s2558_s2 + $0x2a8] sm:$0xff] }
  0x4f   :  { %536 = vmatpush.msra.mxu1 %v415_v19  ;;  %517 = vmatpush.msra.mxu0 %v401_v20  ;;  %v391_v19 = vld [vmem:[%s2558_s2 + $0x360] sm:$0xff]  ;;  %v392_v20 = vld [vmem:[%s2558_s2 + $0x368] sm:$0xff] }
  0x50   :  { %557 = vmatpush.msra.mxu2 %v403_v21  ;;  %505 = vmatpush.msrb.mxu3 %v296_v34  ;;  %v393_v21 = vld [vmem:[%s2558_s2 + $0x370] sm:$0xff]  ;;  %v355_v34 = vld [vmem:[%s2558_s2 + $0x240] sm:$0xff] }
  0x51   :  { %537 = vmatpush.msra.mxu1 %v402_v23  ;;  %518 = vmatpush.msra.mxu0 %v388_v24  ;;  %v378_v23 = vld [vmem:[%s2558_s2 + $0x2f8] sm:$0xff]  ;;  %v379_v24 = vld [vmem:[%s2558_s2 + $0x300] sm:$0xff] }
  0x52   :  { %558 = vmatpush.msra.mxu2 %v390_v25  ;;  %506 = vmatpush.msrb.mxu3 %v283_v38  ;;  %v380_v25 = vld [vmem:[%s2558_s2 + $0x308] sm:$0xff]  ;;  %v342_v38 = vld [vmem:[%s2558_s2 + $0x1d8] sm:$0xff] }
  0x53   :  { %538 = vmatpush.msra.mxu1 %v389_v27  ;;  %519 = vmatpush.msra.mxu0 %v375_v28  ;;  %v365_v27 = vld [vmem:[%s2558_s2 + $0x290] sm:$0xff]  ;;  %v366_v28 = vld [vmem:[%s2558_s2 + $0x298] sm:$0xff] }
  0x54   :  { %559 = vmatpush.msra.mxu2 %v377_v29  ;;  %571 = vmatpush.msra.mxu3 %v482_v42  ;;  %v367_v29 = vld [vmem:[%s2558_s2 + $0x2a0] sm:$0xff]  ;;  %v329_v42 = vld [vmem:[%s2558_s2 + $0x170] sm:$0xff] }
  0x55   :  { %539 = vmatpush.msra.mxu1 %v376_v31  ;;  %520 = vmatpush.msra.mxu0 %v362_v32  ;;  %v352_v31 = vld [vmem:[%s2558_s2 + $0x228] sm:$0xff]  ;;  %v353_v32 = vld [vmem:[%s2558_s2 + $0x230] sm:$0xff] }
  0x56   :  { %560 = vmatpush.msra.mxu2 %v364_v33  ;;  %572 = vmatpush.msra.mxu3 %v469_v46  ;;  %v354_v33 = vld [vmem:[%s2558_s2 + $0x238] sm:$0xff]  ;;  %v316_v46 = vld [vmem:[%s2558_s2 + $0x108] sm:$0xff] }
  0x57   :  { %540 = vmatpush.msra.mxu1 %v363_v35  ;;  %521 = vmatpush.msra.mxu0 %v349_v36  ;;  %v339_v35 = vld [vmem:[%s2558_s2 + $0x1c0] sm:$0xff]  ;;  %v340_v36 = vld [vmem:[%s2558_s2 + $0x1c8] sm:$0xff] }
  0x58   :  { %561 = vmatpush.msra.mxu2 %v351_v37  ;;  %573 = vmatpush.msra.mxu3 %v456_v50  ;;  %v341_v37 = vld [vmem:[%s2558_s2 + $0x1d0] sm:$0xff]  ;;  %v303_v50 = vld [vmem:[%s2558_s2 + $0xa0] sm:$0xff] }
  0x59   :  { %541 = vmatpush.msra.mxu1 %v350_v39  ;;  %522 = vmatpush.msra.mxu0 %v336_v40  ;;  %v326_v39 = vld [vmem:[%s2558_s2 + $0x158] sm:$0xff]  ;;  %v327_v40 = vld [vmem:[%s2558_s2 + $0x160] sm:$0xff] }
  0x5a   :  { %562 = vmatpush.msra.mxu2 %v338_v41  ;;  %574 = vmatpush.msra.mxu3 %v443_v54  ;;  %v328_v41 = vld [vmem:[%s2558_s2 + $0x168] sm:$0xff]  ;;  %v290_v54 = vld [vmem:[%s2558_s2 + $0x38] sm:$0xff] }
  0x5b   :  { %542 = vmatpush.msra.mxu1 %v337_v43  ;;  %523 = vmatpush.msra.mxu0 %v323_v44  ;;  %v313_v43 = vld [vmem:[%s2558_s2 + $0xf0] sm:$0xff]  ;;  %v314_v44 = vld [vmem:[%s2558_s2 + $0xf8] sm:$0xff] }
  0x5c   :  { %563 = vmatpush.msra.mxu2 %v325_v45  ;;  %575 = vmatpush.msra.mxu3 %v430_v0  ;;  %v315_v45 = vld [vmem:[%s2558_s2 + $0x100] sm:$0xff] }
  0x5d   :  { %543 = vmatpush.msra.mxu1 %v324_v47  ;;  %524 = vmatpush.msra.mxu0 %v310_v48  ;;  %v300_v47 = vld [vmem:[%s2558_s2 + $0x88] sm:$0xff]  ;;  %v301_v48 = vld [vmem:[%s2558_s2 + $0x90] sm:$0xff] }
  0x5e   :  { %564 = vmatpush.msra.mxu2 %v312_v49  ;;  %576 = vmatpush.msra.mxu3 %v417_v4  ;;  %v302_v49 = vld [vmem:[%s2558_s2 + $0x98] sm:$0xff] }
  0x5f   :  { %544 = vmatpush.msra.mxu1 %v311_v51  ;;  %525 = vmatpush.msra.mxu0 %v297_v52  ;;  %v287_v51 = vld [vmem:[%s2558_s2 + $0x20] sm:$0xff]  ;;  %v288_v52 = vld [vmem:[%s2558_s2 + $0x28] sm:$0xff]  ;;  %v486_v4 = vld [vmem:[%s2558_s2 + $0x658] sm:$0xff] }
  0x60   :  { %565 = vmatpush.msra.mxu2 %v299_v53  ;;  %577 = vmatpush.msra.mxu3 %v404_v8  ;;  %v289_v53 = vld [vmem:[%s2558_s2 + $0x30] sm:$0xff] }
  0x61   :  { %545 = vmatpush.msra.mxu1 %v298_v55  ;;  %526 = vmatpush.msra.mxu0 %v284_v56  ;;  %v473_v8 = vld [vmem:[%s2558_s2 + $0x5f0] sm:$0xff] }
  0x62   :  { %566 = vmatpush.msra.mxu2 %v286_v57  ;;  %578 = vmatpush.msra.mxu3 %v391_v19  ;;  %v450_v19 = vld [vmem:[%s2558_s2 + $0x538] sm:$0xff] }
  0x63   :  { %591 = vmatpush.msrb.mxu0 %v483_v58  ;;  %546 = vmatpush.msra.mxu1 %v285_v59 }
  0x64   :  { %631 = vmatpush.msrb.mxu2 %v485_v60  ;;  %579 = vmatpush.msra.mxu3 %v378_v23  ;;  %v437_v23 = vld [vmem:[%s2558_s2 + $0x4d0] sm:$0xff] }
  0x65   :  { %611 = vmatpush.msrb.mxu1 %v484_v61  ;;  %592 = vmatpush.msrb.mxu0 %v470_v62 }
  0x66   :  { %632 = vmatpush.msrb.mxu2 %v472_v63  ;;  %580 = vmatpush.msra.mxu3 %v365_v27  ;;  %v424_v27 = vld [vmem:[%s2558_s2 + $0x468] sm:$0xff] }
  0x67   :  { %612 = vmatpush.msrb.mxu1 %v471_v1  ;;  %593 = vmatpush.msrb.mxu0 %v457_v2 }
  0x68   :  { %633 = vmatpush.msrb.mxu2 %v459_v3  ;;  %581 = vmatpush.msra.mxu3 %v352_v31  ;;  %v411_v31 = vld [vmem:[%s2558_s2 + $0x400] sm:$0xff] }
  0x69   :  { %613 = vmatpush.msrb.mxu1 %v458_v5  ;;  %594 = vmatpush.msrb.mxu0 %v444_v6  ;;  %v487_v5 = vld [vmem:[%s2558_s2 + $0x660] sm:$0xff]  ;;  %v488_v6 = vld [vmem:[%s2558_s2 + $0x668] sm:$0xff] }
  0x6a   :  { %634 = vmatpush.msrb.mxu2 %v446_v7  ;;  %582 = vmatpush.msra.mxu3 %v339_v35  ;;  %v489_v7 = vld [vmem:[%s2558_s2 + $0x670] sm:$0xff]  ;;  %v398_v35 = vld [vmem:[%s2558_s2 + $0x398] sm:$0xff] }
  0x6b   :  { %614 = vmatpush.msrb.mxu1 %v445_v9  ;;  %595 = vmatpush.msrb.mxu0 %v431_v10  ;;  %v474_v9 = vld [vmem:[%s2558_s2 + $0x5f8] sm:$0xff]  ;;  %v475_v10 = vld [vmem:[%s2558_s2 + $0x600] sm:$0xff] }
  0x6c   :  { %635 = vmatpush.msrb.mxu2 %v433_v11  ;;  %583 = vmatpush.msra.mxu3 %v326_v39  ;;  %v476_v11 = vld [vmem:[%s2558_s2 + $0x608] sm:$0xff]  ;;  %v385_v39 = vld [vmem:[%s2558_s2 + $0x330] sm:$0xff] }
  0x6d   :  { %615 = vmatpush.msrb.mxu1 %v432_v12  ;;  %596 = vmatpush.msrb.mxu0 %v418_v13  ;;  %v460_v12 = vld [vmem:[%s2558_s2 + $0x588] sm:$0xff]  ;;  %v461_v13 = vld [vmem:[%s2558_s2 + $0x590] sm:$0xff] }
  0x6e   :  { %636 = vmatpush.msrb.mxu2 %v420_v14  ;;  %584 = vmatpush.msra.mxu3 %v313_v43  ;;  %v462_v14 = vld [vmem:[%s2558_s2 + $0x598] sm:$0xff]  ;;  %v372_v43 = vld [vmem:[%s2558_s2 + $0x2c8] sm:$0xff] }
  0x6f   :  { %616 = vmatpush.msrb.mxu1 %v419_v15  ;;  %597 = vmatpush.msrb.mxu0 %v405_v16  ;;  %v463_v15 = vld [vmem:[%s2558_s2 + $0x5a0] sm:$0xff] }
  0x70   :  { %637 = vmatpush.msrb.mxu2 %v407_v17  ;;  %585 = vmatpush.msra.mxu3 %v300_v47  ;;  %v447_v16 = vld [vmem:[%s2558_s2 + $0x520] sm:$0xff]  ;;  %v448_v17 = vld [vmem:[%s2558_s2 + $0x528] sm:$0xff] }
  0x71   :  { %617 = vmatpush.msrb.mxu1 %v406_v18  ;;  %598 = vmatpush.msrb.mxu0 %v392_v20  ;;  %v449_v18 = vld [vmem:[%s2558_s2 + $0x530] sm:$0xff]  ;;  %v434_v20 = vld [vmem:[%s2558_s2 + $0x4b8] sm:$0xff]  ;;  %v359_v47 = vld [vmem:[%s2558_s2 + $0x260] sm:$0xff] }
  0x72   :  { %638 = vmatpush.msrb.mxu2 %v394_v22  ;;  %586 = vmatpush.msra.mxu3 %v287_v51  ;;  %v436_v22 = vld [vmem:[%s2558_s2 + $0x4c8] sm:$0xff]  ;;  %v346_v51 = vld [vmem:[%s2558_s2 + $0x1f8] sm:$0xff] }
  0x73   :  { %618 = vmatpush.msrb.mxu1 %v393_v21  ;;  %599 = vmatpush.msrb.mxu0 %v379_v24  ;;  %v435_v21 = vld [vmem:[%s2558_s2 + $0x4c0] sm:$0xff]  ;;  %v421_v24 = vld [vmem:[%s2558_s2 + $0x450] sm:$0xff] }
  0x74   :  { %639 = vmatpush.msrb.mxu2 %v381_v26  ;;  %v423_v26 = vld [vmem:[%s2558_s2 + $0x460] sm:$0xff] }
  0x75   :  { %619 = vmatpush.msrb.mxu1 %v380_v25  ;;  %600 = vmatpush.msrb.mxu0 %v366_v28  ;;  %v422_v25 = vld [vmem:[%s2558_s2 + $0x458] sm:$0xff]  ;;  %v408_v28 = vld [vmem:[%s2558_s2 + $0x3e8] sm:$0xff] }
  0x76   :  { %640 = vmatpush.msrb.mxu2 %v368_v30  ;;  %v410_v30 = vld [vmem:[%s2558_s2 + $0x3f8] sm:$0xff] }
  0x77   :  { %620 = vmatpush.msrb.mxu1 %v367_v29  ;;  %601 = vmatpush.msrb.mxu0 %v353_v32  ;;  %v409_v29 = vld [vmem:[%s2558_s2 + $0x3f0] sm:$0xff]  ;;  %v395_v32 = vld [vmem:[%s2558_s2 + $0x380] sm:$0xff] }
  0x78   :  { %641 = vmatpush.msrb.mxu2 %v355_v34  ;;  %v397_v34 = vld [vmem:[%s2558_s2 + $0x390] sm:$0xff] }
  0x79   :  { %621 = vmatpush.msrb.mxu1 %v354_v33  ;;  %602 = vmatpush.msrb.mxu0 %v340_v36  ;;  %v396_v33 = vld [vmem:[%s2558_s2 + $0x388] sm:$0xff]  ;;  %v382_v36 = vld [vmem:[%s2558_s2 + $0x318] sm:$0xff] }
  0x7a   :  { %642 = vmatpush.msrb.mxu2 %v342_v38  ;;  %v384_v38 = vld [vmem:[%s2558_s2 + $0x328] sm:$0xff] }
  0x7b   :  { %622 = vmatpush.msrb.mxu1 %v341_v37  ;;  %603 = vmatpush.msrb.mxu0 %v327_v40  ;;  %v383_v37 = vld [vmem:[%s2558_s2 + $0x320] sm:$0xff]  ;;  %v369_v40 = vld [vmem:[%s2558_s2 + $0x2b0] sm:$0xff] }
  0x7c   :  { %643 = vmatpush.msrb.mxu2 %v329_v42  ;;  %v371_v42 = vld [vmem:[%s2558_s2 + $0x2c0] sm:$0xff] }
  0x7d   :  { %623 = vmatpush.msrb.mxu1 %v328_v41  ;;  %604 = vmatpush.msrb.mxu0 %v314_v44  ;;  %v370_v41 = vld [vmem:[%s2558_s2 + $0x2b8] sm:$0xff]  ;;  %v356_v44 = vld [vmem:[%s2558_s2 + $0x248] sm:$0xff] }
  0x7e   :  { %644 = vmatpush.msrb.mxu2 %v316_v46  ;;  %v358_v46 = vld [vmem:[%s2558_s2 + $0x258] sm:$0xff] }
  0x7f   :  { %624 = vmatpush.msrb.mxu1 %v315_v45  ;;  %605 = vmatpush.msrb.mxu0 %v301_v48  ;;  %v357_v45 = vld [vmem:[%s2558_s2 + $0x250] sm:$0xff]  ;;  %v343_v48 = vld [vmem:[%s2558_s2 + $0x1e0] sm:$0xff] }
  0x80   :  { %645 = vmatpush.msrb.mxu2 %v303_v50  ;;  %v345_v50 = vld [vmem:[%s2558_s2 + $0x1f0] sm:$0xff] }
  0x81   :  { %625 = vmatpush.msrb.mxu1 %v302_v49  ;;  %606 = vmatpush.msrb.mxu0 %v288_v52  ;;  %v344_v49 = vld [vmem:[%s2558_s2 + $0x1e8] sm:$0xff]  ;;  %v330_v52 = vld [vmem:[%s2558_s2 + $0x178] sm:$0xff] }
  0x82   :  { %646 = vmatpush.msrb.mxu2 %v290_v54  ;;  %v332_v54 = vld [vmem:[%s2558_s2 + $0x188] sm:$0xff] }
  0x83   :  { %626 = vmatpush.msrb.mxu1 %v289_v53  ;;  %v331_v53 = vld [vmem:[%s2558_s2 + $0x180] sm:$0xff] }
  0xa6   :  { %v159_v55 = vpop.f32.mrf.mxu0 }
  0xaa   :  { %v179_v56 = vpop.f32.mrf.mxu1 }
  0xab   :  { %v180_v57 = vadd.f32 %v179_v56, %v159_v55  ;;  %v333_v55 = vld [vmem:[%s2558_s2 + $0x190] sm:$0xff] }
  0xac   :  { %v317_v56 = vld [vmem:[%s2558_s2 + $0x110] sm:$0xff] }
  0xae   :  { %v219_v59 = vpop.f32.mrf.mxu3 }
  0xbb   :  { %v199_v58 = vpop.f32.mrf.mxu2 }
  0xbc   :  { %v200_v60 = vadd.f32 %v199_v58, %v180_v57  ;;  %v318_v57 = vld [vmem:[%s2558_s2 + $0x118] sm:$0xff]  ;;  %v319_v58 = vld [vmem:[%s2558_s2 + $0x120] sm:$0xff] }
  0xbe   :  { %v220_v61 = vadd.f32 %v219_v59, %v200_v60  ;;  %v320_v59 = vld [vmem:[%s2558_s2 + $0x128] sm:$0xff] }
  0xbf   :  { %v239_v62 = vpop.f32.mrf.mxu0  ;;  %v304_v60 = vld [vmem:[%s2558_s2 + $0xa8] sm:$0xff] }
  0xc0   :  { %v240_v63 = vadd.f32 %v239_v62, %v220_v61  ;;  %v305_v61 = vld [vmem:[%s2558_s2 + $0xb0] sm:$0xff]  ;;  %v306_v62 = vld [vmem:[%s2558_s2 + $0xb8] sm:$0xff] }
  0xc1   :  { %v259_v0 = vpop.f32.mrf.mxu1 }
  0xc2   :  { %v260_v1 = vadd.f32 %v259_v0, %v240_v63  ;;  %v307_v63 = vld [vmem:[%s2558_s2 + $0xc0] sm:$0xff] }
  0xc3   :  { %v291_v0 = vld [vmem:[%s2558_s2 + $0x40] sm:$0xff] }
  0xc5   :  { %v279_v2 = vpop.f32.mrf.mxu2 }
  0xc6   :  { %v1852_v3 = vadd.f32 %v279_v2, %v260_v1  ;;  %v292_v1 = vld [vmem:[%s2558_s2 + $0x48] sm:$0xff]  ;;  %v293_v2 = vld [vmem:[%s2558_s2 + $0x50] sm:$0xff] }
  0xc8   :  { %282 = vst [vmem:[%s2559_s5] sm:$0xff] %v1852_v3  ;;  %507 = vmatmul.f32.vlgmr.msrb.gmra.mxu3 %v1852_v3  ;;  %527 = vmatmul.f32.vlgmr.msra.gmra.mxu0 %v1852_v3 }
  0xc9   :  { %547 = vmatmul.f32.vlgmr.msra.gmra.mxu1 %v1852_v3  ;;  %567 = vmatmul.f32.vlgmr.msra.gmra.mxu2 %v1852_v3 }
  0xca   :  { %651 = vmatpush.msrb.mxu3 %v486_v4  ;;  %671 = vmatpush.msra.mxu0 %v487_v5  ;;  %v294_v4 = vld [vmem:[%s2558_s2 + $0x58] sm:$0xff] }
  0xcb   :  { %691 = vmatpush.msra.mxu1 %v488_v6  ;;  %711 = vmatpush.msra.mxu2 %v489_v7  ;;  %v490_v5 = vld [vmem:[%s2558_s2 + $0x678] sm:$0xff]  ;;  %v477_v7 = vld [vmem:[%s2558_s2 + $0x610] sm:$0xff] }
  0xcc   :  { %652 = vmatpush.msrb.mxu3 %v473_v8  ;;  %672 = vmatpush.msra.mxu0 %v474_v9  ;;  %v779_v6 = vld [vmem:[%s2560_s3 + $0x78] sm:$0xff]  ;;  %v778_v8 = vld [vmem:[%s2560_s3 + $0x70] sm:$0xff]  ;;  %v464_v9 = vld [vmem:[%s2558_s2 + $0x5a8] sm:$0xff] }
  0xcd   :  { %692 = vmatpush.msra.mxu1 %v475_v10  ;;  %712 = vmatpush.msra.mxu2 %v476_v11  ;;  %v777_v10 = vld [vmem:[%s2560_s3 + $0x68] sm:$0xff]  ;;  %v451_v11 = vld [vmem:[%s2558_s2 + $0x540] sm:$0xff] }
  0xce   :  { %653 = vmatpush.msrb.mxu3 %v460_v12  ;;  %673 = vmatpush.msra.mxu0 %v461_v13  ;;  %v776_v12 = vld [vmem:[%s2560_s3 + $0x60] sm:$0xff]  ;;  %v438_v13 = vld [vmem:[%s2558_s2 + $0x4d8] sm:$0xff] }
  0xcf   :  { %693 = vmatpush.msra.mxu1 %v462_v14  ;;  %713 = vmatpush.msra.mxu2 %v463_v15  ;;  %v775_v14 = vld [vmem:[%s2560_s3 + $0x58] sm:$0xff]  ;;  %v425_v15 = vld [vmem:[%s2558_s2 + $0x470] sm:$0xff] }
  0xd0   :  { %654 = vmatpush.msrb.mxu3 %v447_v16  ;;  %674 = vmatpush.msra.mxu0 %v448_v17  ;;  %v774_v16 = vld [vmem:[%s2560_s3 + $0x50] sm:$0xff]  ;;  %v412_v17 = vld [vmem:[%s2558_s2 + $0x408] sm:$0xff] }
  0xd1   :  { %694 = vmatpush.msra.mxu1 %v449_v18  ;;  %714 = vmatpush.msra.mxu2 %v450_v19  ;;  %v773_v18 = vld [vmem:[%s2560_s3 + $0x48] sm:$0xff]  ;;  %v399_v19 = vld [vmem:[%s2558_s2 + $0x3a0] sm:$0xff] }
  0xd2   :  { %587 = vmatmul.f32.vlgmr.msra.gmra.mxu3 %v1852_v3  ;;  %607 = vmatmul.f32.vlgmr.msrb.gmra.mxu0 %v1852_v3 }
  0xd3   :  { %627 = vmatmul.f32.vlgmr.msrb.gmra.mxu1 %v1852_v3  ;;  %647 = vmatmul.f32.vlgmr.msrb.gmra.mxu2 %v1852_v3 }
  0xd4   :  { %655 = vmatpush.msrb.mxu3 %v434_v20  ;;  %675 = vmatpush.msra.mxu0 %v435_v21  ;;  %v772_v20 = vld [vmem:[%s2560_s3 + $0x40] sm:$0xff]  ;;  %v386_v21 = vld [vmem:[%s2558_s2 + $0x338] sm:$0xff] }
  0xd5   :  { %695 = vmatpush.msra.mxu1 %v436_v22  ;;  %715 = vmatpush.msra.mxu2 %v437_v23  ;;  %v771_v22 = vld [vmem:[%s2560_s3 + $0x38] sm:$0xff]  ;;  %v373_v23 = vld [vmem:[%s2558_s2 + $0x2d0] sm:$0xff] }
  0xd6   :  { %656 = vmatpush.msrb.mxu3 %v421_v24  ;;  %676 = vmatpush.msra.mxu0 %v422_v25  ;;  %v770_v24 = vld [vmem:[%s2560_s3 + $0x30] sm:$0xff]  ;;  %v360_v25 = vld [vmem:[%s2558_s2 + $0x268] sm:$0xff] }
  0xd7   :  { %696 = vmatpush.msra.mxu1 %v423_v26  ;;  %716 = vmatpush.msra.mxu2 %v424_v27  ;;  %v769_v26 = vld [vmem:[%s2560_s3 + $0x28] sm:$0xff]  ;;  %v347_v27 = vld [vmem:[%s2558_s2 + $0x200] sm:$0xff] }
  0xd8   :  { %657 = vmatpush.msrb.mxu3 %v408_v28  ;;  %677 = vmatpush.msra.mxu0 %v409_v29  ;;  %v768_v28 = vld [vmem:[%s2560_s3 + $0x20] sm:$0xff]  ;;  %v334_v29 = vld [vmem:[%s2558_s2 + $0x198] sm:$0xff] }
  0xd9   :  { %697 = vmatpush.msra.mxu1 %v410_v30  ;;  %717 = vmatpush.msra.mxu2 %v411_v31  ;;  %v767_v30 = vld [vmem:[%s2560_s3 + $0x18] sm:$0xff]  ;;  %v321_v31 = vld [vmem:[%s2558_s2 + $0x130] sm:$0xff] }
  0xda   :  { %658 = vmatpush.msrb.mxu3 %v395_v32  ;;  %678 = vmatpush.msra.mxu0 %v396_v33  ;;  %v766_v32 = vld [vmem:[%s2560_s3 + $0x10] sm:$0xff]  ;;  %v308_v33 = vld [vmem:[%s2558_s2 + $0xc8] sm:$0xff] }
  0xdb   :  { %698 = vmatpush.msra.mxu1 %v397_v34  ;;  %718 = vmatpush.msra.mxu2 %v398_v35  ;;  %v765_v34 = vld [vmem:[%s2560_s3 + $0x8] sm:$0xff]  ;;  %v295_v35 = vld [vmem:[%s2558_s2 + $0x60] sm:$0xff] }
  0xdc   :  { %659 = vmatpush.msrb.mxu3 %v382_v36  ;;  %679 = vmatpush.msra.mxu0 %v383_v37  ;;  %v764_v36 = vld [vmem:[%s2560_s3] sm:$0xff]  ;;  %v905_v37 = vld [vmem:[%s2561_s4 + $0x348] sm:$0xff] }
  0xdd   :  { %699 = vmatpush.msra.mxu1 %v384_v38  ;;  %719 = vmatpush.msra.mxu2 %v385_v39  ;;  %v906_v38 = vld [vmem:[%s2561_s4 + $0x350] sm:$0xff]  ;;  %v907_v39 = vld [vmem:[%s2561_s4 + $0x358] sm:$0xff] }
  0xde   :  { %660 = vmatpush.msrb.mxu3 %v369_v40  ;;  %680 = vmatpush.msra.mxu0 %v370_v41  ;;  %v898_v40 = vld [vmem:[%s2561_s4 + $0x310] sm:$0xff]  ;;  %v900_v41 = vld [vmem:[%s2561_s4 + $0x320] sm:$0xff] }
  0xdf   :  { %700 = vmatpush.msra.mxu1 %v371_v42  ;;  %720 = vmatpush.msra.mxu2 %v372_v43  ;;  %v891_v42 = vld [vmem:[%s2561_s4 + $0x2d8] sm:$0xff]  ;;  %v892_v43 = vld [vmem:[%s2561_s4 + $0x2e0] sm:$0xff] }
  0xe0   :  { %661 = vmatpush.msrb.mxu3 %v356_v44  ;;  %681 = vmatpush.msra.mxu0 %v357_v45  ;;  %v893_v44 = vld [vmem:[%s2561_s4 + $0x2e8] sm:$0xff]  ;;  %v884_v45 = vld [vmem:[%s2561_s4 + $0x2a0] sm:$0xff] }
  0xe1   :  { %701 = vmatpush.msra.mxu1 %v358_v46  ;;  %721 = vmatpush.msra.mxu2 %v359_v47  ;;  %v885_v46 = vld [vmem:[%s2561_s4 + $0x2a8] sm:$0xff]  ;;  %v886_v47 = vld [vmem:[%s2561_s4 + $0x2b0] sm:$0xff] }
  0xe2   :  { %662 = vmatpush.msrb.mxu3 %v343_v48  ;;  %682 = vmatpush.msra.mxu0 %v344_v49  ;;  %v877_v48 = vld [vmem:[%s2561_s4 + $0x268] sm:$0xff]  ;;  %v878_v49 = vld [vmem:[%s2561_s4 + $0x270] sm:$0xff] }
  0xe3   :  { %702 = vmatpush.msra.mxu1 %v345_v50  ;;  %722 = vmatpush.msra.mxu2 %v346_v51  ;;  %v879_v50 = vld [vmem:[%s2561_s4 + $0x278] sm:$0xff]  ;;  %v870_v51 = vld [vmem:[%s2561_s4 + $0x230] sm:$0xff] }
  0xe4   :  { %663 = vmatpush.msrb.mxu3 %v330_v52  ;;  %683 = vmatpush.msra.mxu0 %v331_v53  ;;  %v871_v52 = vld [vmem:[%s2561_s4 + $0x238] sm:$0xff]  ;;  %v872_v53 = vld [vmem:[%s2561_s4 + $0x240] sm:$0xff] }
  0xe5   :  { %703 = vmatpush.msra.mxu1 %v332_v54  ;;  %723 = vmatpush.msra.mxu2 %v333_v55  ;;  %v863_v54 = vld [vmem:[%s2561_s4 + $0x1f8] sm:$0xff]  ;;  %v864_v55 = vld [vmem:[%s2561_s4 + $0x200] sm:$0xff] }
  0xe6   :  { %664 = vmatpush.msrb.mxu3 %v317_v56  ;;  %684 = vmatpush.msra.mxu0 %v318_v57  ;;  %v865_v56 = vld [vmem:[%s2561_s4 + $0x208] sm:$0xff]  ;;  %v856_v57 = vld [vmem:[%s2561_s4 + $0x1c0] sm:$0xff] }
  0xe7   :  { %704 = vmatpush.msra.mxu1 %v319_v58  ;;  %724 = vmatpush.msra.mxu2 %v320_v59  ;;  %v857_v58 = vld [vmem:[%s2561_s4 + $0x1c8] sm:$0xff]  ;;  %v858_v59 = vld [vmem:[%s2561_s4 + $0x1d0] sm:$0xff] }
  0xe8   :  { %665 = vmatpush.msrb.mxu3 %v304_v60  ;;  %685 = vmatpush.msra.mxu0 %v305_v61  ;;  %v849_v60 = vld [vmem:[%s2561_s4 + $0x188] sm:$0xff]  ;;  %v850_v61 = vld [vmem:[%s2561_s4 + $0x190] sm:$0xff] }
  0xe9   :  { %705 = vmatpush.msra.mxu1 %v306_v62  ;;  %725 = vmatpush.msra.mxu2 %v307_v63  ;;  %v851_v62 = vld [vmem:[%s2561_s4 + $0x198] sm:$0xff]  ;;  %v842_v63 = vld [vmem:[%s2561_s4 + $0x150] sm:$0xff] }
  0xea   :  { %666 = vmatpush.msrb.mxu3 %v291_v0  ;;  %686 = vmatpush.msra.mxu0 %v292_v1  ;;  %v843_v0 = vld [vmem:[%s2561_s4 + $0x158] sm:$0xff]  ;;  %v844_v1 = vld [vmem:[%s2561_s4 + $0x160] sm:$0xff] }
  0xeb   :  { %706 = vmatpush.msra.mxu1 %v293_v2  ;;  %726 = vmatpush.msra.mxu2 %v294_v4  ;;  %v835_v2 = vld [vmem:[%s2561_s4 + $0x118] sm:$0xff]  ;;  %v836_v4 = vld [vmem:[%s2561_s4 + $0x120] sm:$0xff] }
  0xec   :  { %667 = vmatmul.f32.vlgmr.msrb.gmra.mxu3 %v1852_v3  ;;  %687 = vmatmul.f32.vlgmr.msra.gmra.mxu0 %v1852_v3 }
  0xed   :  { %707 = vmatmul.f32.vlgmr.msra.gmra.mxu1 %v1852_v3  ;;  %727 = vmatmul.f32.vlgmr.msra.gmra.mxu2 %v1852_v3 }
  0xee   :  { %731 = vmatpush.msra.mxu3 %v490_v5  ;;  %780 = vmatpush.msrb.mxu0 %v779_v6  ;;  %v837_v5 = vld [vmem:[%s2561_s4 + $0x128] sm:$0xff] }
  0xef   :  { %912 = vmatpush.msrb.mxu1 %v905_v37  ;;  %932 = vmatpush.msrb.mxu2 %v906_v38  ;;  %v903_v37 = vld [vmem:[%s2561_s4 + $0x338] sm:$0xff] }
  0xf0   :  { %732 = vmatpush.msra.mxu3 %v477_v7  ;;  %781 = vmatpush.msrb.mxu0 %v778_v8  ;;  %v828_v8 = vld [vmem:[%s2561_s4 + $0xe0] sm:$0xff] }
  0xf1   :  { %913 = vmatpush.msrb.mxu1 %v898_v40  ;;  %v866_v40 = vld [vmem:[%s2561_s4 + $0x210] sm:$0xff] }
  0xf2   :  { %733 = vmatpush.msra.mxu3 %v464_v9  ;;  %782 = vmatpush.msrb.mxu0 %v777_v10  ;;  %v829_v9 = vld [vmem:[%s2561_s4 + $0xe8] sm:$0xff]  ;;  %v830_v10 = vld [vmem:[%s2561_s4 + $0xf0] sm:$0xff] }
  0xf3   :  { %914 = vmatpush.msrb.mxu1 %v891_v42  ;;  %v896_v42 = vld [vmem:[%s2561_s4 + $0x300] sm:$0xff] }
  0xf4   :  { %734 = vmatpush.msra.mxu3 %v451_v11  ;;  %783 = vmatpush.msrb.mxu0 %v776_v12  ;;  %v908_v12 = vld [vmem:[%s2561_s4 + $0x360] sm:$0xff] }
  0xf5   :  { %915 = vmatpush.msrb.mxu1 %v884_v45  ;;  %v888_v45 = vld [vmem:[%s2561_s4 + $0x2c0] sm:$0xff] }
  0xf6   :  { %735 = vmatpush.msra.mxu3 %v438_v13  ;;  %784 = vmatpush.msrb.mxu0 %v775_v14  ;;  %v821_v13 = vld [vmem:[%s2561_s4 + $0xa8] sm:$0xff]  ;;  %v822_v14 = vld [vmem:[%s2561_s4 + $0xb0] sm:$0xff] }
  0xf7   :  { %916 = vmatpush.msrb.mxu1 %v877_v48  ;;  %v852_v48 = vld [vmem:[%s2561_s4 + $0x1a0] sm:$0xff] }
  0xf8   :  { %736 = vmatpush.msra.mxu3 %v425_v15  ;;  %785 = vmatpush.msrb.mxu0 %v774_v16  ;;  %v823_v16 = vld [vmem:[%s2561_s4 + $0xb8] sm:$0xff] }
  0xf9   :  { %917 = vmatpush.msrb.mxu1 %v870_v51  ;;  %v883_v51 = vld [vmem:[%s2561_s4 + $0x298] sm:$0xff] }
  0xfa   :  { %737 = vmatpush.msra.mxu3 %v412_v17  ;;  %786 = vmatpush.msrb.mxu0 %v773_v18  ;;  %v901_v17 = vld [vmem:[%s2561_s4 + $0x328] sm:$0xff]  ;;  %v814_v18 = vld [vmem:[%s2561_s4 + $0x70] sm:$0xff] }
  0xfb   :  { %918 = vmatpush.msrb.mxu1 %v863_v54  ;;  %v875_v54 = vld [vmem:[%s2561_s4 + $0x258] sm:$0xff] }
  0xfc   :  { %738 = vmatpush.msra.mxu3 %v399_v19  ;;  %787 = vmatpush.msrb.mxu0 %v772_v20  ;;  %v815_v19 = vld [vmem:[%s2561_s4 + $0x78] sm:$0xff]  ;;  %v816_v20 = vld [vmem:[%s2561_s4 + $0x80] sm:$0xff] }
  0xfd   :  { %919 = vmatpush.msrb.mxu1 %v856_v57  ;;  %v867_v57 = vld [vmem:[%s2561_s4 + $0x218] sm:$0xff] }
  0xfe   :  { %739 = vmatpush.msra.mxu3 %v386_v21  ;;  %788 = vmatpush.msrb.mxu0 %v771_v22  ;;  %v894_v21 = vld [vmem:[%s2561_s4 + $0x2f0] sm:$0xff] }
  0xff   :  { %920 = vmatpush.msrb.mxu1 %v849_v60  ;;  %v831_v60 = vld [vmem:[%s2561_s4 + $0xf8] sm:$0xff] }
 0x100   :  { %740 = vmatpush.msra.mxu3 %v373_v23  ;;  %789 = vmatpush.msrb.mxu0 %v770_v24  ;;  %v807_v24 = vld [vmem:[%s2561_s4 + $0x38] sm:$0xff] }
 0x101   :  { %921 = vmatpush.msrb.mxu1 %v842_v63  ;;  %v862_v63 = vld [vmem:[%s2561_s4 + $0x1f0] sm:$0xff] }
 0x102   :  { %741 = vmatpush.msra.mxu3 %v360_v25  ;;  %790 = vmatpush.msrb.mxu0 %v769_v26  ;;  %v808_v25 = vld [vmem:[%s2561_s4 + $0x40] sm:$0xff]  ;;  %v809_v26 = vld [vmem:[%s2561_s4 + $0x48] sm:$0xff] }
 0x103   :  { %922 = vmatpush.msrb.mxu1 %v835_v2  ;;  %v854_v2 = vld [vmem:[%s2561_s4 + $0x1b0] sm:$0xff] }
 0x104   :  { %742 = vmatpush.msra.mxu3 %v347_v27  ;;  %791 = vmatpush.msrb.mxu0 %v768_v28  ;;  %v887_v27 = vld [vmem:[%s2561_s4 + $0x2b8] sm:$0xff]  ;;  %v800_v28 = vld [vmem:[%s2561_s4] sm:$0xff] }
 0x105   :  { %923 = vmatpush.msrb.mxu1 %v828_v8  ;;  %v848_v8 = vld [vmem:[%s2561_s4 + $0x180] sm:$0xff] }
 0x106   :  { %743 = vmatpush.msra.mxu3 %v334_v29  ;;  %792 = vmatpush.msrb.mxu0 %v767_v30  ;;  %v801_v29 = vld [vmem:[%s2561_s4 + $0x8] sm:$0xff]  ;;  %v802_v30 = vld [vmem:[%s2561_s4 + $0x10] sm:$0xff] }
 0x107   :  { %924 = vmatpush.msrb.mxu1 %v821_v13 }
 0x108   :  { %744 = vmatpush.msra.mxu3 %v321_v31  ;;  %793 = vmatpush.msrb.mxu0 %v766_v32  ;;  %v880_v31 = vld [vmem:[%s2561_s4 + $0x280] sm:$0xff]  ;;  %v909_v32 = vld [vmem:[%s2561_s4 + $0x368] sm:$0xff] }
 0x109   :  { %925 = vmatpush.msrb.mxu1 %v814_v18  ;;  %v834_v18 = vld [vmem:[%s2561_s4 + $0x110] sm:$0xff] }
 0x10a   :  { %745 = vmatpush.msra.mxu3 %v308_v33  ;;  %794 = vmatpush.msrb.mxu0 %v765_v34  ;;  %v910_v33 = vld [vmem:[%s2561_s4 + $0x370] sm:$0xff]  ;;  %v911_v34 = vld [vmem:[%s2561_s4 + $0x378] sm:$0xff] }
 0x10b   :  { %926 = vmatpush.msrb.mxu1 %v807_v24  ;;  %v820_v24 = vld [vmem:[%s2561_s4 + $0xa0] sm:$0xff] }
 0x10c   :  { %746 = vmatpush.msra.mxu3 %v295_v35  ;;  %795 = vmatpush.msrb.mxu0 %v764_v36  ;;  %v873_v35 = vld [vmem:[%s2561_s4 + $0x248] sm:$0xff]  ;;  %v902_v36 = vld [vmem:[%s2561_s4 + $0x330] sm:$0xff] }
 0x10d   :  { %747 = vmatmul.f32.vlgmr.msra.gmra.mxu3 %v1852_v3  ;;  %796 = vmatmul.f32.vlgmr.msrb.gmra.mxu0 %v1852_v3  ;;  %v899_v3 = vld [vmem:[%s2561_s4 + $0x318] sm:$0xff] }
 0x10e   :  { %952 = vmatpush.msrb.mxu3 %v907_v39  ;;  %933 = vmatpush.msrb.mxu2 %v899_v3  ;;  %v904_v39 = vld [vmem:[%s2561_s4 + $0x340] sm:$0xff] }
 0x10f   :  { %972 = vmatpush.msra.mxu0 %v908_v12  ;;  %927 = vmatpush.msrb.mxu1 %v800_v28  ;;  %v841_v12 = vld [vmem:[%s2561_s4 + $0x148] sm:$0xff]  ;;  %v812_v28 = vld [vmem:[%s2561_s4 + $0x60] sm:$0xff] }
 0x110   :  { %953 = vmatpush.msrb.mxu3 %v900_v41  ;;  %934 = vmatpush.msrb.mxu2 %v892_v43  ;;  %v895_v41 = vld [vmem:[%s2561_s4 + $0x2f8] sm:$0xff]  ;;  %v897_v43 = vld [vmem:[%s2561_s4 + $0x308] sm:$0xff] }
 0x111   :  { %973 = vmatpush.msra.mxu0 %v901_v17  ;;  %992 = vmatpush.msra.mxu1 %v909_v32  ;;  %v806_v32 = vld [vmem:[%s2561_s4 + $0x30] sm:$0xff] }
 0x112   :  { %954 = vmatpush.msrb.mxu3 %v893_v44  ;;  %935 = vmatpush.msrb.mxu2 %v885_v46  ;;  %v859_v44 = vld [vmem:[%s2561_s4 + $0x1d8] sm:$0xff]  ;;  %v889_v46 = vld [vmem:[%s2561_s4 + $0x2c8] sm:$0xff] }
 0x113   :  { %974 = vmatpush.msra.mxu0 %v894_v21  ;;  %993 = vmatpush.msra.mxu1 %v902_v36  ;;  %v827_v21 = vld [vmem:[%s2561_s4 + $0xd8] sm:$0xff] }
 0x114   :  { %955 = vmatpush.msrb.mxu3 %v886_v47  ;;  %936 = vmatpush.msrb.mxu2 %v878_v49  ;;  %v890_v47 = vld [vmem:[%s2561_s4 + $0x2d0] sm:$0xff]  ;;  %v881_v49 = vld [vmem:[%s2561_s4 + $0x288] sm:$0xff] }
 0x115   :  { %975 = vmatpush.msra.mxu0 %v887_v27  ;;  %994 = vmatpush.msra.mxu1 %v895_v41  ;;  %v811_v27 = vld [vmem:[%s2561_s4 + $0x58] sm:$0xff] }
 0x116   :  { %956 = vmatpush.msrb.mxu3 %v879_v50  ;;  %937 = vmatpush.msrb.mxu2 %v871_v52  ;;  %v882_v50 = vld [vmem:[%s2561_s4 + $0x290] sm:$0xff]  ;;  %v845_v52 = vld [vmem:[%s2561_s4 + $0x168] sm:$0xff] }
 0x117   :  { %976 = vmatpush.msra.mxu0 %v880_v31  ;;  %995 = vmatpush.msra.mxu1 %v888_v45  ;;  %v805_v31 = vld [vmem:[%s2561_s4 + $0x28] sm:$0xff] }
 0x118   :  { %957 = vmatpush.msrb.mxu3 %v872_v53  ;;  %938 = vmatpush.msrb.mxu2 %v864_v55  ;;  %v874_v53 = vld [vmem:[%s2561_s4 + $0x250] sm:$0xff]  ;;  %v876_v55 = vld [vmem:[%s2561_s4 + $0x260] sm:$0xff] }
 0x119   :  { %977 = vmatpush.msra.mxu0 %v873_v35  ;;  %996 = vmatpush.msra.mxu1 %v881_v49 }
 0x11a   :  { %958 = vmatpush.msrb.mxu3 %v865_v56  ;;  %939 = vmatpush.msrb.mxu2 %v857_v58  ;;  %v838_v56 = vld [vmem:[%s2561_s4 + $0x130] sm:$0xff]  ;;  %v868_v58 = vld [vmem:[%s2561_s4 + $0x220] sm:$0xff] }
 0x11b   :  { %978 = vmatpush.msra.mxu0 %v866_v40  ;;  %997 = vmatpush.msra.mxu1 %v874_v53 }
 0x11c   :  { %959 = vmatpush.msrb.mxu3 %v858_v59  ;;  %940 = vmatpush.msrb.mxu2 %v850_v61  ;;  %v869_v59 = vld [vmem:[%s2561_s4 + $0x228] sm:$0xff]  ;;  %v860_v61 = vld [vmem:[%s2561_s4 + $0x1e0] sm:$0xff] }
 0x11d   :  { %979 = vmatpush.msra.mxu0 %v859_v44  ;;  %998 = vmatpush.msra.mxu1 %v867_v57 }
 0x11e   :  { %960 = vmatpush.msrb.mxu3 %v851_v62  ;;  %941 = vmatpush.msrb.mxu2 %v843_v0  ;;  %v861_v62 = vld [vmem:[%s2561_s4 + $0x1e8] sm:$0xff]  ;;  %v824_v0 = vld [vmem:[%s2561_s4 + $0xc0] sm:$0xff] }
 0x11f   :  { %980 = vmatpush.msra.mxu0 %v852_v48  ;;  %999 = vmatpush.msra.mxu1 %v860_v61 }
 0x120   :  { %961 = vmatpush.msrb.mxu3 %v844_v1  ;;  %942 = vmatpush.msrb.mxu2 %v836_v4  ;;  %v853_v1 = vld [vmem:[%s2561_s4 + $0x1a8] sm:$0xff]  ;;  %v855_v4 = vld [vmem:[%s2561_s4 + $0x1b8] sm:$0xff] }
 0x121   :  { %981 = vmatpush.msra.mxu0 %v845_v52  ;;  %1000 = vmatpush.msra.mxu1 %v853_v1 }
 0x122   :  { %962 = vmatpush.msrb.mxu3 %v837_v5  ;;  %943 = vmatpush.msrb.mxu2 %v829_v9  ;;  %v817_v5 = vld [vmem:[%s2561_s4 + $0x88] sm:$0xff]  ;;  %v810_v9 = vld [vmem:[%s2561_s4 + $0x50] sm:$0xff] }
 0x123   :  { %982 = vmatpush.msra.mxu0 %v838_v56 }
 0x124   :  { %963 = vmatpush.msrb.mxu3 %v830_v10  ;;  %944 = vmatpush.msrb.mxu2 %v822_v14  ;;  %v839_v10 = vld [vmem:[%s2561_s4 + $0x138] sm:$0xff] }
 0x125   :  { %983 = vmatpush.msra.mxu0 %v831_v60  ;;  %v803_v14 = vld [vmem:[%s2561_s4 + $0x18] sm:$0xff] }
 0x126   :  { %964 = vmatpush.msrb.mxu3 %v823_v16  ;;  %945 = vmatpush.msrb.mxu2 %v815_v19  ;;  %v833_v16 = vld [vmem:[%s2561_s4 + $0x108] sm:$0xff] }
 0x127   :  { %984 = vmatpush.msra.mxu0 %v824_v0  ;;  %v825_v19 = vld [vmem:[%s2561_s4 + $0xc8] sm:$0xff] }
 0x128   :  { %965 = vmatpush.msrb.mxu3 %v816_v20  ;;  %946 = vmatpush.msrb.mxu2 %v808_v25  ;;  %v826_v20 = vld [vmem:[%s2561_s4 + $0xd0] sm:$0xff] }
 0x129   :  { %985 = vmatpush.msra.mxu0 %v817_v5 }
 0x12a   :  { %966 = vmatpush.msrb.mxu3 %v809_v26  ;;  %947 = vmatpush.msrb.mxu2 %v801_v29  ;;  %v813_v29 = vld [vmem:[%s2561_s4 + $0x68] sm:$0xff] }
 0x12b   :  { %986 = vmatpush.msra.mxu0 %v810_v9 }
 0x12c   :  { %967 = vmatpush.msrb.mxu3 %v802_v30  ;;  %1012 = vmatpush.msra.mxu2 %v910_v33  ;;  %v804_v30 = vld [vmem:[%s2561_s4 + $0x20] sm:$0xff] }
 0x12d   :  { %987 = vmatpush.msra.mxu0 %v803_v14 }
 0x12e   :  { %1032 = vmatpush.msra.mxu3 %v911_v34  ;;  %1013 = vmatpush.msra.mxu2 %v903_v37 }
 0x130   :  { %1033 = vmatpush.msra.mxu3 %v904_v39  ;;  %1014 = vmatpush.msra.mxu2 %v896_v42 }
 0x132   :  { %1034 = vmatpush.msra.mxu3 %v897_v43  ;;  %1015 = vmatpush.msra.mxu2 %v889_v46 }
 0x134   :  { %1035 = vmatpush.msra.mxu3 %v890_v47  ;;  %1016 = vmatpush.msra.mxu2 %v882_v50 }
 0x136   :  { %1036 = vmatpush.msra.mxu3 %v883_v51  ;;  %1017 = vmatpush.msra.mxu2 %v875_v54 }
 0x138   :  { %1037 = vmatpush.msra.mxu3 %v876_v55  ;;  %1018 = vmatpush.msra.mxu2 %v868_v58 }
 0x13a   :  { %1038 = vmatpush.msra.mxu3 %v869_v59  ;;  %1019 = vmatpush.msra.mxu2 %v861_v62 }
 0x13c   :  { %1039 = vmatpush.msra.mxu3 %v862_v63  ;;  %1020 = vmatpush.msra.mxu2 %v854_v2 }
 0x13e   :  { %1040 = vmatpush.msra.mxu3 %v855_v4 }
 0x140   :  { %1041 = vmatpush.msra.mxu3 %v848_v8 }
 0x142   :  { %1042 = vmatpush.msra.mxu3 %v841_v12 }
 0x144   :  { %1043 = vmatpush.msra.mxu3 %v834_v18 }
 0x145   :  { %v528_v6 = vpop.f32.mrf.mxu0 }
 0x146   :  { %752 = vst [vmem:[%s2562_s6 + $0x8] sm:$0xff] %v528_v6  ;;  %v548_v7 = vpop.f32.mrf.mxu1  ;;  %v846_v6 = vld [vmem:[%s2561_s4 + $0x170] sm:$0xff]  ;;  %1044 = vmatpush.msra.mxu3 %v827_v21 }
 0x147   :  { %753 = vst [vmem:[%s2562_s6 + $0x10] sm:$0xff] %v548_v7  ;;  %v847_v7 = vld [vmem:[%s2561_s4 + $0x178] sm:$0xff]  ;;  %1001 = vmatpush.msra.mxu1 %v846_v6 }
 0x148   :  { %1021 = vmatpush.msra.mxu2 %v847_v7  ;;  %1045 = vmatpush.msra.mxu3 %v820_v24 }
 0x149   :  { %1002 = vmatpush.msra.mxu1 %v839_v10 }
 0x14a   :  { %1046 = vmatpush.msra.mxu3 %v813_v29 }
 0x14b   :  { %v508_v11 = vpop.f32.mrf.mxu3 }
 0x14c   :  { %751 = vst [vmem:[%s2562_s6] sm:$0xff] %v508_v11  ;;  %v568_v15 = vpop.f32.mrf.mxu2  ;;  %v840_v11 = vld [vmem:[%s2561_s4 + $0x140] sm:$0xff]  ;;  %1047 = vmatpush.msra.mxu3 %v806_v32 }
 0x14d   :  { %754 = vst [vmem:[%s2562_s6 + $0x18] sm:$0xff] %v568_v15  ;;  %1022 = vmatpush.msra.mxu2 %v840_v11  ;;  %v832_v15 = vld [vmem:[%s2561_s4 + $0x100] sm:$0xff] }
 0x14e   :  { %1003 = vmatpush.msra.mxu1 %v832_v15 }
 0x14f   :  { %v608_v22 = vpop.f32.mrf.mxu0  ;;  %1023 = vmatpush.msra.mxu2 %v833_v16 }
 0x150   :  { %756 = vst [vmem:[%s2562_s6 + $0x28] sm:$0xff] %v608_v22  ;;  %v628_v23 = vpop.f32.mrf.mxu1  ;;  %1004 = vmatpush.msra.mxu1 %v825_v19  ;;  %v818_v22 = vld [vmem:[%s2561_s4 + $0x90] sm:$0xff] }
 0x151   :  { %757 = vst [vmem:[%s2562_s6 + $0x30] sm:$0xff] %v628_v23  ;;  %1024 = vmatpush.msra.mxu2 %v826_v20  ;;  %v819_v23 = vld [vmem:[%s2561_s4 + $0x98] sm:$0xff] }
 0x152   :  { %1005 = vmatpush.msra.mxu1 %v818_v22 }
 0x153   :  { %1025 = vmatpush.msra.mxu2 %v819_v23 }
 0x154   :  { %1006 = vmatpush.msra.mxu1 %v811_v27 }
 0x155   :  { %v588_v38 = vpop.f32.mrf.mxu3  ;;  %1026 = vmatpush.msra.mxu2 %v812_v28 }
 0x156   :  { %755 = vst [vmem:[%s2562_s6 + $0x20] sm:$0xff] %v588_v38  ;;  %v648_v3 = vpop.f32.mrf.mxu2  ;;  %1007 = vmatpush.msra.mxu1 %v804_v30 }
 0x157   :  { %758 = vst [vmem:[%s2562_s6 + $0x38] sm:$0xff] %v648_v3  ;;  %1027 = vmatpush.msra.mxu2 %v805_v31 }
 0x169   :  { %v688_v13 = vpop.f32.mrf.mxu0 }
 0x16a   :  { %760 = vst [vmem:[%s2562_s6 + $0x48] sm:$0xff] %v688_v13  ;;  %v708_v17 = vpop.f32.mrf.mxu1 }
 0x16b   :  { %761 = vst [vmem:[%s2562_s6 + $0x50] sm:$0xff] %v708_v17 }
 0x16f   :  { %v668_v25 = vpop.f32.mrf.mxu3 }
 0x170   :  { %759 = vst [vmem:[%s2562_s6 + $0x40] sm:$0xff] %v668_v25  ;;  %v728_v26 = vpop.f32.mrf.mxu2 }
 0x171   :  { %762 = vst [vmem:[%s2562_s6 + $0x58] sm:$0xff] %v728_v26 }
 0x18a   :  { %v797_v33 = vpop.f32.mrf.mxu0 }
 0x18b   :  { %928 = vmatmul.f32.vlgmr.msrb.gmra.mxu1 %v797_v33  ;;  %948 = vmatmul.f32.vlgmr.msrb.gmra.mxu2 %v797_v33 }
 0x18c   :  { %968 = vmatmul.f32.vlgmr.msrb.gmra.mxu3 %v797_v33  ;;  %988 = vmatmul.f32.vlgmr.msra.gmra.mxu0 %v797_v33 }
 0x190   :  { %v748_v34 = vpop.f32.mrf.mxu3 }
 0x191   :  { %763 = vst [vmem:[%s2562_s6 + $0x60] sm:$0xff] %v748_v34 }
 0x193   :  { %1008 = vmatmul.f32.vlgmr.msra.gmra.mxu1 %v797_v33  ;;  %1028 = vmatmul.f32.vlgmr.msra.gmra.mxu2 %v797_v33 }
 0x194   :  { %1048 = vmatmul.f32.vlgmr.msra.gmra.mxu3 %v797_v33 }
 0x208   :  { %v929_v35 = vpop.f32.mrf.mxu1 }
 0x209   :  { %1052 = vst [vmem:[%s2563_s7] sm:$0xff] %v929_v35  ;;  %v989_v36 = vpop.f32.mrf.mxu0 }
 0x20a   :  { %1055 = vst [vmem:[%s2563_s7 + $0x18] sm:$0xff] %v989_v36 }
 0x20e   :  { %v949_v37 = vpop.f32.mrf.mxu2 }
 0x20f   :  { %1053 = vst [vmem:[%s2563_s7 + $0x8] sm:$0xff] %v949_v37  ;;  %v969_v38 = vpop.f32.mrf.mxu3 }
 0x210   :  { %1054 = vst [vmem:[%s2563_s7 + $0x10] sm:$0xff] %v969_v38  ;;  %v1009_v39 = vpop.f32.mrf.mxu1 }
 0x211   :  { %1056 = vst [vmem:[%s2563_s7 + $0x20] sm:$0xff] %v1009_v39 }
 0x216   :  { %v1029_v40 = vpop.f32.mrf.mxu2 }
 0x217   :  { %1057 = vst [vmem:[%s2563_s7 + $0x28] sm:$0xff] %v1029_v40  ;;  %v1049_v3 = vpop.f32.mrf.mxu3 }
 0x218   :  { %1058 = vst [vmem:[%s2563_s7 + $0x30] sm:$0xff] %v1049_v3 }

</bundles_post_ra>
